<compile_context>
chip_gen: v7x
topology: tpu7x:2x2x1
jax: 0.10.0
libtpu: 0.0.40
codegen_flags: <defaults>
</compile_context>

<pallas_src>
import functools

import jax
import jax.numpy as jnp
from jax.experimental import pallas as pl
from jax.experimental.pallas import tpu as pltpu

EPS = 1e-5


# --------------------------------------------------------------------------
# Small helpers
# --------------------------------------------------------------------------
def _round_up(x, m):
    return (x + m - 1) // m * m


@functools.lru_cache(maxsize=None)
def _vmem_limit_bytes():
    """Per-generation VMEM budget: ~3/4 of physical (v7x: 48 MiB; v5e/v6e: 96 MiB)."""
    try:
        cap = int(pltpu.get_tpu_info().vmem_capacity_bytes)
    except Exception:
        cap = 64 * 1024 * 1024
    return int(min(cap * 3 // 4, 112 * 1024 * 1024))


def _pick_row_tile(M, cap=512):
    """Matmul row tile: multiple of 8, <= cap, >=2 row blocks when possible (megacore)."""
    M8 = _round_up(max(M, 8), 8)
    tm = min(cap, M8)
    if M8 > 8 and _round_up(M, tm) // tm < 2:
        tm = max(8, _round_up((M8 + 1) // 2, 8))
    return tm


def _pick_div_tile(Mp, cap=2048):
    """Largest multiple-of-8 divisor of Mp <= cap, preferring >=2 blocks (megacore)."""
    cands = [c for c in range(min(cap, Mp), 7, -8) if Mp % c == 0]
    if not cands:
        return Mp
    for c in cands:
        if Mp // c >= 2:
            return c
    return cands[0]


def _pick_k(K):
    """Pad K and pick tk. Small K -> single k-step; large K -> tk in {256, 512}."""
    Kp = _round_up(K, 128)
    if Kp <= 512:
        return Kp, Kp
    Kp = _round_up(K, 256)
    tk = 512 if Kp % 512 == 0 else 256
    return Kp, tk


def _pick_col_tile(Np):
    for c in (512, 256, 128):
        if Np % c == 0:
            return c
    return Np


# --------------------------------------------------------------------------
# Kernel 1: tiled bf16 matmul (full-N tiles) with fused BatchNorm-stats epilogue
# --------------------------------------------------------------------------
def _matmul_stats_kernel(a_ref, b_ref, o_ref, sum_ref, sq_ref, acc_ref):
    k = pl.program_id(1)
    nk = pl.num_programs(1)
    prod = jnp.dot(a_ref[...], b_ref[...], preferred_element_type=jnp.float32)

    @pl.when(k == 0)
    def _():
        acc_ref[...] = prod            # direct write: no zero-init read-modify-write

    @pl.when(k > 0)
    def _():
        acc_ref[...] += prod

    @pl.when(k == nk - 1)
    def _():
        acc = acc_ref[...]
        o_ref[...] = acc.astype(o_ref.dtype)
        # Per-M-tile partial BN statistics (from the f32 accumulator), replicated over
        # 8 sublanes so the stats output obeys the (8, 128) tiling.
        s = jnp.sum(acc, axis=0, keepdims=True)
        q = jnp.sum(acc * acc, axis=0, keepdims=True)
        sum_ref[...] = jnp.broadcast_to(s, sum_ref.shape)
        sq_ref[...] = jnp.broadcast_to(q, sq_ref.shape)


def matmul_with_stats(a, b, *, tm, tk, out_dtype=jnp.bfloat16):
    """(M,K)@(K,N) -> (out[M,N], colsum[(M//tm)*8, N], colsumsq[(M//tm)*8, N]).

    Single N block (tn = N): the large LHS is streamed from HBM exactly once.
    """
    M, K = a.shape
    Kb, Np = b.shape
    assert K == Kb and M % tm == 0 and K % tk == 0
    mt, kt = M // tm, K // tk
    return pl.pallas_call(
        _matmul_stats_kernel,
        grid=(mt, kt),                                      # k innermost (accumulator)
        in_specs=[
            pl.BlockSpec((tm, tk), lambda i, k: (i, k)),
            pl.BlockSpec((tk, Np), lambda i, k: (k, 0)),
        ],
        out_specs=(
            pl.BlockSpec((tm, Np), lambda i, k: (i, 0)),
            pl.BlockSpec((8, Np), lambda i, k: (i, 0)),
            pl.BlockSpec((8, Np), lambda i, k: (i, 0)),
        ),
        out_shape=(
            jax.ShapeDtypeStruct((M, Np), out_dtype),
            jax.ShapeDtypeStruct((mt * 8, Np), jnp.float32),
            jax.ShapeDtypeStruct((mt * 8, Np), jnp.float32),
        ),
        scratch_shapes=[pltpu.VMEM((tm, Np), jnp.float32)],
        compiler_params=pltpu.CompilerParams(
            dimension_semantics=("parallel", "arbitrary"),
            vmem_limit_bytes=_vmem_limit_bytes()),
    )(a, b)


# --------------------------------------------------------------------------
# Kernel 2: tiled reduction of partial sums -> per-channel BN (scale, shift)
# --------------------------------------------------------------------------
def _bn_finalize_kernel(sum_ref, sq_ref, g_ref, b_ref, scale_ref, shift_ref,
                        acc_s, acc_q, *, inv_count):
    r = pl.program_id(1)
    ps = jnp.sum(sum_ref[...], axis=0, keepdims=True)
    pq = jnp.sum(sq_ref[...], axis=0, keepdims=True)

    @pl.when(r == 0)
    def _():
        acc_s[...] = ps
        acc_q[...] = pq

    @pl.when(r > 0)
    def _():
        acc_s[...] += ps
        acc_q[...] += pq

    @pl.when(r == pl.num_programs(1) - 1)
    def _():
        mean = acc_s[...] * inv_count
        ex2 = acc_q[...] * inv_count
        # One-pass E[x^2]-E[x]^2 (biased, like PyTorch BN batch stats); clamp for safety.
        var = jnp.maximum(ex2 - mean * mean, 0.0)
        inv = jax.lax.rsqrt(var + EPS)
        scale = g_ref[...] * inv
        scale_ref[...] = scale
        shift_ref[...] = b_ref[...] - mean * scale


def bn_finalize(sums, sqs, gamma, beta, count):
    R, Np = sums.shape
    cn = _pick_col_tile(Np)
    rchunk = _pick_div_tile(R, 1024)
    return pl.pallas_call(
        functools.partial(_bn_finalize_kernel, inv_count=1.0 / (8.0 * float(count))),
        grid=(Np // cn, R // rchunk),                       # row chunks innermost
        in_specs=[
            pl.BlockSpec((rchunk, cn), lambda c, r: (r, c)),
            pl.BlockSpec((rchunk, cn), lambda c, r: (r, c)),
            pl.BlockSpec((1, cn), lambda c, r: (0, c)),
            pl.BlockSpec((1, cn), lambda c, r: (0, c)),
        ],
        out_specs=(
            pl.BlockSpec((1, cn), lambda c, r: (0, c)),
            pl.BlockSpec((1, cn), lambda c, r: (0, c)),
        ),
        out_shape=(jax.ShapeDtypeStruct((1, Np), jnp.float32),
                   jax.ShapeDtypeStruct((1, Np), jnp.float32)),
        scratch_shapes=[pltpu.VMEM((1, cn), jnp.float32),
                        pltpu.VMEM((1, cn), jnp.float32)],
        compiler_params=pltpu.CompilerParams(
            dimension_semantics=("parallel", "arbitrary"),
            vmem_limit_bytes=_vmem_limit_bytes()),
    )(sums, sqs, gamma, beta)


# --------------------------------------------------------------------------
# Kernel 3: row-tiled BN apply (scale * x + shift, optional ReLU)
# --------------------------------------------------------------------------
def _scale_shift_kernel(x_ref, scale_ref, shift_ref, o_ref, *, relu):
    y = x_ref[...].astype(jnp.float32) * scale_ref[...] + shift_ref[...]
    if relu:
        y = jnp.maximum(y, 0.0)
    o_ref[...] = y.astype(o_ref.dtype)


def bn_scale_shift(x, scale, shift, *, tm, relu, out_dtype):
    M, C = x.shape
    return pl.pallas_call(
        functools.partial(_scale_shift_kernel, relu=relu),
        grid=(M // tm,),
        in_specs=[
            pl.BlockSpec((tm, C), lambda i: (i, 0)),
            pl.BlockSpec((1, C), lambda i: (0, 0)),
            pl.BlockSpec((1, C), lambda i: (0, 0)),
        ],
        out_specs=pl.BlockSpec((tm, C), lambda i: (i, 0)),
        out_shape=jax.ShapeDtypeStruct((M, C), out_dtype),
        compiler_params=pltpu.CompilerParams(
            dimension_semantics=("parallel",),
            vmem_limit_bytes=_vmem_limit_bytes()),
    )(x, scale, shift)


# --------------------------------------------------------------------------
# Kernel 4: row-tiled fused BN(out2) + BN(shortcut) + add + ReLU  (bf16 output)
# --------------------------------------------------------------------------
def _bn_add_relu_kernel(x2_ref, sc_ref, s2_ref, t2_ref, ssc_ref, tsc_ref, o_ref):
    y = x2_ref[...].astype(jnp.float32) * s2_ref[...] + t2_ref[...]
    y = y + sc_ref[...].astype(jnp.float32) * ssc_ref[...] + tsc_ref[...]
    o_ref[...] = jnp.maximum(y, 0.0).astype(o_ref.dtype)


def bn_add_relu(out2, scale2, shift2, out_sc, scale_sc, shift_sc, *, tm):
    M, C = out2.shape
    return pl.pallas_call(
        _bn_add_relu_kernel,
        grid=(M // tm,),
        in_specs=[
            pl.BlockSpec((tm, C), lambda i: (i, 0)),
            pl.BlockSpec((tm, C), lambda i: (i, 0)),
            pl.BlockSpec((1, C), lambda i: (0, 0)),
            pl.BlockSpec((1, C), lambda i: (0, 0)),
            pl.BlockSpec((1, C), lambda i: (0, 0)),
            pl.BlockSpec((1, C), lambda i: (0, 0)),
        ],
        out_specs=pl.BlockSpec((tm, C), lambda i: (i, 0)),
        out_shape=jax.ShapeDtypeStruct((M, C), jnp.bfloat16),
        compiler_params=pltpu.CompilerParams(
            dimension_semantics=("parallel",),
            vmem_limit_bytes=_vmem_limit_bytes()),
    )(out2, out_sc, scale2, shift2, scale_sc, shift_sc)


# --------------------------------------------------------------------------
# Glue: im2col, parameters, forward
# --------------------------------------------------------------------------
def im2col(x_nhwc, ksize, stride, pad):
    """Extract conv patches; returns ((N*Ho*Wo, ksize*ksize*C), (N, Ho, Wo))."""
    # TODO(synk): fold the taps into the matmul kernel (implicit GEMM with halo / tap
    # grid axis) to avoid materializing this 9x buffer in HBM.
    N, H, W, C = x_nhwc.shape
    xp = jnp.pad(x_nhwc, ((0, 0), (pad, pad), (pad, pad), (0, 0)))
    Ho = (H + 2 * pad - ksize) // stride + 1
    Wo = (W + 2 * pad - ksize) // stride + 1
    cols = []
    for i in range(ksize):
        for j in range(ksize):
            cols.append(xp[:, i:i + stride * Ho:stride, j:j + stride * Wo:stride, :])
    patches = jnp.stack(cols, axis=-2)                       # (N,Ho,Wo,k*k,C)
    return patches.reshape(N * Ho * Wo, ksize * ksize * C), (N, Ho, Wo)


def init_params(key, c_in, c_out):
    """Deterministic synthetic parameters (shapes follow the PyTorch __init__)."""
    k1, k2, k3 = jax.random.split(key, 3)
    w1 = jax.random.normal(k1, (3 * 3 * c_in, c_out), jnp.float32) * 0.1
    w2 = jax.random.normal(k2, (3 * 3 * c_out, c_out), jnp.float32) * 0.1
    w_sc = jax.random.normal(k3, (1 * 1 * c_in, c_out), jnp.float32) * 0.1
    ones = jnp.ones((1, c_out), jnp.float32)
    zeros = jnp.zeros((1, c_out), jnp.float32)
    return dict(w1=w1, w2=w2, w_sc=w_sc,
                g1=ones, b1=zeros,        # BN inside residual_function_2
                g3=ones, b3=zeros,        # BN in residual_function_3
                g_sc=ones, b_sc=zeros)    # BN in shortcut


def _pad_vec(v, c2p):
    return jnp.pad(v, ((0, 0), (0, c2p - v.shape[1])))


def basic_block1_forward(x_nchw, params, stride):
    x = jnp.transpose(x_nchw, (0, 2, 3, 1))                       # NHWC
    N, H, W, c_in = x.shape
    c_out = params["w1"].shape[1]
    # TODO(synk): identity-shortcut configuration (stride==1 and Cin==Cout) not wired up;
    # this implementation covers the projection-shortcut path the module instantiates.
    assert stride != 1 or c_in != c_out

    c2p = _round_up(c_out, 128)          # lane-padded channel width
    xb = x.astype(jnp.bfloat16)          # bf16 activations for MXU + smaller im2col

    # ---- conv1 (3x3, stride) --------------------------------------------------
    cols1, (_, H1, W1) = im2col(xb, 3, stride, 1)                 # (M1, 9*c_in) bf16
    M1 = N * H1 * W1
    tm = _pick_row_tile(M1)
    Mp = _round_up(M1, tm)
    K1 = 9 * c_in
    K1p, tk1 = _pick_k(K1)

    a1cols = jnp.pad(cols1, ((0, Mp - M1), (0, K1p - K1)))        # single pad, zero rows
    w1p = jnp.pad(params["w1"], ((0, K1p - K1), (0, c2p - c_out))).astype(jnp.bfloat16)
    out1, sum1, sq1 = matmul_with_stats(a1cols, w1p, tm=tm, tk=tk1)

    scale1, shift1 = bn_finalize(sum1, sq1,
                                 _pad_vec(params["g1"], c2p),
                                 _pad_vec(params["b1"], c2p), M1)

    # ---- a1 = ReLU(BN(out1))  (large row tiles, lane-dense) ---------------------
    tm_e = _pick_div_tile(Mp, 2048)
    a1 = bn_scale_shift(out1, scale1, shift1, tm=tm_e, relu=True,
                        out_dtype=jnp.bfloat16)

    # ---- shortcut: 1x1 stride conv as its own small matmul (K = c_in) -----------
    xs = xb[:, ::stride, ::stride, :].reshape(M1, c_in)
    Kscp, tksc = _pick_k(c_in)
    xsp = jnp.pad(xs, ((0, Mp - M1), (0, Kscp - c_in)))
    wscp = jnp.pad(params["w_sc"], ((0, Kscp - c_in), (0, c2p - c_out))).astype(jnp.bfloat16)
    out_sc, sum_sc, sq_sc = matmul_with_stats(xsp, wscp, tm=tm, tk=tksc)
    scale_sc, shift_sc = bn_finalize(sum_sc, sq_sc,
                                     _pad_vec(params["g_sc"], c2p),
                                     _pad_vec(params["b_sc"], c2p), M1)

    # ---- conv2 (3x3, stride 1) --------------------------------------------------
    a1_hw = a1[:M1].reshape(N, H1, W1, c2p)
    cols2, _ = im2col(a1_hw, 3, 1, 1)                             # (M1, 9*c2p) bf16
    K2 = 9 * c2p
    K2p, tk2 = _pick_k(K2)
    a2cols = jnp.pad(cols2, ((0, Mp - M1), (0, K2p - K2)))
    w2_t = params["w2"].reshape(9, c_out, c_out)
    w2p = jnp.pad(w2_t, ((0, 0), (0, c2p - c_out), (0, c2p - c_out))).reshape(9 * c2p, c2p)
    w2p = jnp.pad(w2p, ((0, K2p - 9 * c2p), (0, 0))).astype(jnp.bfloat16)

    out2, sum2, sq2 = matmul_with_stats(a2cols, w2p, tm=tm, tk=tk2)
    scale2, shift2 = bn_finalize(sum2, sq2,
                                 _pad_vec(params["g3"], c2p),
                                 _pad_vec(params["b3"], c2p), M1)

    # ---- outf = ReLU(BN(out2) + BN(shortcut))  (fused, bf16 store) ---------------
    outf = bn_add_relu(out2, scale2, shift2, out_sc, scale_sc, shift_sc, tm=tm_e)

    outf = outf[:M1, :c_out].astype(jnp.float32).reshape(N, H1, W1, c_out)
    return jnp.transpose(outf, (0, 3, 1, 2))                      # back to NCHW


def basic_block1_reference(x_nchw, params, stride):
    """Pure-JAX f32 reference (same math, no Pallas) for a sanity check."""
    def bn(x, g, b, relu):
        mean = x.mean(axis=0, keepdims=True)
        var = ((x - mean) ** 2).mean(axis=0, keepdims=True)
        y = (x - mean) * jax.lax.rsqrt(var + EPS) * g + b
        return jnp.maximum(y, 0.0) if relu else y

    x = jnp.transpose(x_nchw, (0, 2, 3, 1)).astype(jnp.float32)
    N, H, W, c_in = x.shape
    c_out = params["w1"].shape[1]
    cols1, (_, H1, W1) = im2col(x, 3, stride, 1)
    out1 = cols1 @ params["w1"]
    a1 = bn(out1, params["g1"], params["b1"], relu=True)
    cols2, _ = im2col(a1.reshape(N, H1, W1, c_out), 3, 1, 1)
    out2 = cols2 @ params["w2"]
    sc = x[:, ::stride, ::stride, :].reshape(N * H1 * W1, c_in) @ params["w_sc"]
    sc_bn = bn(sc, params["g_sc"], params["b_sc"], relu=False)
    outf = jnp.maximum(bn(out2, params["g3"], params["b3"], relu=False) + sc_bn, 0.0)
    return jnp.transpose(outf.reshape(N, H1, W1, c_out), (0, 3, 1, 2))


if __name__ == "__main__":
    key = jax.random.PRNGKey(0)
    k_x, k_p = jax.random.split(key)

    N, C_IN, C_OUT, HW, STRIDE = 2, 4, 8, 16, 2
    x = jax.random.normal(k_x, (N, C_IN, HW, HW), jnp.float32)    # NCHW, like PyTorch
    params = init_params(k_p, C_IN, C_OUT)

    fwd = jax.jit(basic_block1_forward, static_argnums=(2,))
    out = jax.block_until_ready(fwd(x, params, STRIDE))

    ref = basic_block1_reference(x, params, STRIDE)
    assert out.shape == (N, C_OUT, HW // STRIDE, HW // STRIDE), out.shape
    # bf16 MXU operands / bf16 final store -> loosened tolerance vs the pure-f32 reference
    assert jnp.allclose(out, ref, atol=5e-2, rtol=5e-2), float(jnp.max(jnp.abs(out - ref)))

    print("KERNEL_OK")
</pallas_src>

<mosaic_0001>
module attributes {stable_mosaic.version = 11 : i64} {
  func.func @_scale_shift_kernel(%arg0: i32, %arg1: memref<64x128xbf16, #tpu.memory_space<vmem>>, %arg2: memref<1x128xf32, #tpu.memory_space<vmem>>, %arg3: memref<1x128xf32, #tpu.memory_space<vmem>>, %arg4: memref<64x128xbf16, #tpu.memory_space<vmem>>) attributes {dimension_semantics = [#tpu.dimension_semantics<parallel>], iteration_bounds = array<i64: 2>, scalar_prefetch = 0 : i64, scratch_operands = 0 : i64, tpu.core_type = #tpu.core_type<tc>, window_params = [{transform_indices = @transform_0, window_bounds = array<i64: 64, 128>}, {pipeline_mode = #tpu.pipeline_mode<synchronous>, transform_indices = @transform_1, window_bounds = array<i64: 1, 128>}, {pipeline_mode = #tpu.pipeline_mode<synchronous>, transform_indices = @transform_2, window_bounds = array<i64: 1, 128>}, {transform_indices = @transform_3, window_bounds = array<i64: 64, 128>}]} {
    %c0 = arith.constant 0 : index
    %c0_0 = arith.constant 0 : index
    %0 = vector.load %arg1[%c0, %c0_0] : memref<64x128xbf16, #tpu.memory_space<vmem>>, vector<64x128xbf16>
    %1 = arith.extf %0 : vector<64x128xbf16> to vector<64x128xf32>
    %c0_1 = arith.constant 0 : index
    %c0_2 = arith.constant 0 : index
    %2 = vector.load %arg2[%c0_1, %c0_2] : memref<1x128xf32, #tpu.memory_space<vmem>>, vector<1x128xf32>
    %3 = vector.broadcast %2 : vector<1x128xf32> to vector<64x128xf32>
    %4 = arith.mulf %1, %3 : vector<64x128xf32>
    %c0_3 = arith.constant 0 : index
    %c0_4 = arith.constant 0 : index
    %5 = vector.load %arg3[%c0_3, %c0_4] : memref<1x128xf32, #tpu.memory_space<vmem>>, vector<1x128xf32>
    %6 = vector.broadcast %5 : vector<1x128xf32> to vector<64x128xf32>
    %7 = arith.addf %4, %6 : vector<64x128xf32>
    %cst = arith.constant 0.000000e+00 : f32
    %8 = vector.broadcast %cst : f32 to vector<64x128xf32>
    %9 = arith.maximumf %7, %8 : vector<64x128xf32>
    %10 = arith.truncf %9 : vector<64x128xf32> to vector<64x128xbf16>
    %c0_5 = arith.constant 0 : index
    %c0_6 = arith.constant 0 : index
    %11 = vector.load %arg4[%c0_5, %c0_6] : memref<64x128xbf16, #tpu.memory_space<vmem>>, vector<64x128xbf16>
    tpu.vector_store %arg4[%c0_5, %c0_6], %10 {strides = array<i32>} : memref<64x128xbf16, #tpu.memory_space<vmem>>, vector<64x128xbf16>,
    return
  }
  func.func @transform_0(%arg0: i32) -> (i32, i32) {
    %c0_i32 = arith.constant 0 : i32
    %c0_i32_0 = arith.constant 0 : i32
    return %arg0, %c0_i32 : i32, i32
  }
  func.func @transform_1(%arg0: i32) -> (i32, i32) {
    %c0_i32 = arith.constant 0 : i32
    %c0_i32_0 = arith.constant 0 : i32
    %c0_i32_1 = arith.constant 0 : i32
    return %c0_i32, %c0_i32_0 : i32, i32
  }
  func.func @transform_2(%arg0: i32) -> (i32, i32) {
    %c0_i32 = arith.constant 0 : i32
    %c0_i32_0 = arith.constant 0 : i32
    %c0_i32_1 = arith.constant 0 : i32
    return %c0_i32, %c0_i32_0 : i32, i32
  }
  func.func @transform_3(%arg0: i32) -> (i32, i32) {
    %c0_i32 = arith.constant 0 : i32
    %c0_i32_0 = arith.constant 0 : i32
    return %arg0, %c0_i32 : i32, i32
  }
}

module attributes {stable_mosaic.version = 11 : i64} {
  func.func @_matmul_stats_kernel(%arg0: i32, %arg1: i32, %arg2: memref<64x128xbf16, #tpu.memory_space<vmem>>, %arg3: memref<128x128xbf16, #tpu.memory_space<vmem>>, %arg4: memref<64x128xbf16, #tpu.memory_space<vmem>>, %arg5: memref<8x128xf32, #tpu.memory_space<vmem>>, %arg6: memref<8x128xf32, #tpu.memory_space<vmem>>, %arg7: memref<64x128xf32, #tpu.memory_space<vmem>>) attributes {dimension_semantics = [#tpu.dimension_semantics<parallel>, #tpu.dimension_semantics<arbitrary>], iteration_bounds = array<i64: 2, 1>, scalar_prefetch = 0 : i64, scratch_operands = 1 : i64, tpu.core_type = #tpu.core_type<tc>, window_params = [{transform_indices = @transform_0, window_bounds = array<i64: 64, 128>}, {transform_indices = @transform_1, window_bounds = array<i64: 128, 128>}, {transform_indices = @transform_2, window_bounds = array<i64: 64, 128>}, {transform_indices = @transform_3, window_bounds = array<i64: 8, 128>}, {transform_indices = @transform_4, window_bounds = array<i64: 8, 128>}]} {
    %c0 = arith.constant 0 : index
    %c0_0 = arith.constant 0 : index
    %0 = vector.load %arg2[%c0, %c0_0] : memref<64x128xbf16, #tpu.memory_space<vmem>>, vector<64x128xbf16>
    %c0_1 = arith.constant 0 : index
    %c0_2 = arith.constant 0 : index
    %1 = vector.load %arg3[%c0_1, %c0_2] : memref<128x128xbf16, #tpu.memory_space<vmem>>, vector<128x128xbf16>
    %cst = arith.constant dense<0.000000e+00> : vector<64x128xf32>
    %2 = tpu.matmul %0, %1, %cst {dimension_numbers = #tpu.dot_dimension_numbers<[1], [0], [0], [1], [0, 0, 1, 1], [], []>} : vector<64x128xbf16>, vector<128x128xbf16>, vector<64x128xf32> -> vector<64x128xf32>
    %c0_i32 = arith.constant 0 : i32
    %3 = arith.cmpi eq, %arg1, %c0_i32 : i32
    %4 = arith.extui %3 : i1 to i32
    %c0_i32_3 = arith.constant 0 : i32
    %5 = arith.cmpi ne, %4, %c0_i32_3 : i32
    scf.if %5 {
      %c0_8 = arith.constant 0 : index
      %c0_9 = arith.constant 0 : index
      %12 = vector.load %arg7[%c0_8, %c0_9] : memref<64x128xf32, #tpu.memory_space<vmem>>, vector<64x128xf32>
      tpu.vector_store %arg7[%c0_8, %c0_9], %2 {strides = array<i32>} : memref<64x128xf32, #tpu.memory_space<vmem>>, vector<64x128xf32>,
    } else {
    }
    %c0_i32_4 = arith.constant 0 : i32
    %6 = arith.cmpi sgt, %arg1, %c0_i32_4 : i32
    %7 = arith.extui %6 : i1 to i32
    %c0_i32_5 = arith.constant 0 : i32
    %8 = arith.cmpi ne, %7, %c0_i32_5 : i32
    scf.if %8 {
      %c0_8 = arith.constant 0 : index
      %c0_9 = arith.constant 0 : index
      %12 = vector.load %arg7[%c0_8, %c0_9] : memref<64x128xf32, #tpu.memory_space<vmem>>, vector<64x128xf32>
      %13 = arith.addf %12, %2 : vector<64x128xf32>
      %c0_10 = arith.constant 0 : index
      %c0_11 = arith.constant 0 : index
      %14 = vector.load %arg7[%c0_10, %c0_11] : memref<64x128xf32, #tpu.memory_space<vmem>>, vector<64x128xf32>
      tpu.vector_store %arg7[%c0_10, %c0_11], %13 {strides = array<i32>} : memref<64x128xf32, #tpu.memory_space<vmem>>, vector<64x128xf32>,
    } else {
    }
    %c0_i32_6 = arith.constant 0 : i32
    %9 = arith.cmpi eq, %arg1, %c0_i32_6 : i32
    %10 = arith.extui %9 : i1 to i32
    %c0_i32_7 = arith.constant 0 : i32
    %11 = arith.cmpi ne, %10, %c0_i32_7 : i32
    scf.if %11 {
      %c0_8 = arith.constant 0 : index
      %c0_9 = arith.constant 0 : index
      %12 = vector.load %arg7[%c0_8, %c0_9] : memref<64x128xf32, #tpu.memory_space<vmem>>, vector<64x128xf32>
      %13 = arith.truncf %12 : vector<64x128xf32> to vector<64x128xbf16>
      %c0_10 = arith.constant 0 : index
      %c0_11 = arith.constant 0 : index
      %14 = vector.load %arg4[%c0_10, %c0_11] : memref<64x128xbf16, #tpu.memory_space<vmem>>, vector<64x128xbf16>
      tpu.vector_store %arg4[%c0_10, %c0_11], %13 {strides = array<i32>} : memref<64x128xbf16, #tpu.memory_space<vmem>>, vector<64x128xbf16>,
      %cst_12 = arith.constant dense<0.000000e+00> : vector<128xf32>
      %15 = vector.multi_reduction <add>, %12, %cst_12 [0] : vector<64x128xf32> to vector<128xf32>
      %16 = vector.shape_cast %15 : vector<128xf32> to vector<1x128xf32>
      %17 = arith.mulf %12, %12 : vector<64x128xf32>
      %cst_13 = arith.constant dense<0.000000e+00> : vector<128xf32>
      %18 = vector.multi_reduction <add>, %17, %cst_13 [0] : vector<64x128xf32> to vector<128xf32>
      %19 = vector.shape_cast %18 : vector<128xf32> to vector<1x128xf32>
      %20 = vector.shape_cast %16 : vector<1x128xf32> to vector<1x128xf32>
      %21 = vector.broadcast %20 : vector<1x128xf32> to vector<8x128xf32>
      %c0_14 = arith.constant 0 : index
      %c0_15 = arith.constant 0 : index
      %22 = vector.load %arg5[%c0_14, %c0_15] : memref<8x128xf32, #tpu.memory_space<vmem>>, vector<8x128xf32>
      tpu.vector_store %arg5[%c0_14, %c0_15], %21 {strides = array<i32>} : memref<8x128xf32, #tpu.memory_space<vmem>>, vector<8x128xf32>,
      %23 = vector.shape_cast %19 : vector<1x128xf32> to vector<1x128xf32>
      %24 = vector.broadcast %23 : vector<1x128xf32> to vector<8x128xf32>
      %c0_16 = arith.constant 0 : index
      %c0_17 = arith.constant 0 : index
      %25 = vector.load %arg6[%c0_16, %c0_17] : memref<8x128xf32, #tpu.memory_space<vmem>>, vector<8x128xf32>
      tpu.vector_store %arg6[%c0_16, %c0_17], %24 {strides = array<i32>} : memref<8x128xf32, #tpu.memory_space<vmem>>, vector<8x128xf32>,
    } else {
    }
    return
  }
  func.func @transform_0(%arg0: i32, %arg1: i32) -> (i32, i32) {
    %c0_i32 = arith.constant 0 : i32
    return %arg0, %arg1 : i32, i32
  }
  func.func @transform_1(%arg0: i32, %arg1: i32) -> (i32, i32) {
    %c0_i32 = arith.constant 0 : i32
    %c0_i32_0 = arith.constant 0 : i32
    return %arg1, %c0_i32 : i32, i32
  }
  func.func @transform_2(%arg0: i32, %arg1: i32) -> (i32, i32) {
    %c0_i32 = arith.constant 0 : i32
    %c0_i32_0 = arith.constant 0 : i32
    return %arg0, %c0_i32 : i32, i32
  }
  func.func @transform_3(%arg0: i32, %arg1: i32) -> (i32, i32) {
    %c0_i32 = arith.constant 0 : i32
    %c0_i32_0 = arith.constant 0 : i32
    return %arg0, %c0_i32 : i32, i32
  }
  func.func @transform_4(%arg0: i32, %arg1: i32) -> (i32, i32) {
    %c0_i32 = arith.constant 0 : i32
    %c0_i32_0 = arith.constant 0 : i32
    return %arg0, %c0_i32 : i32, i32
  }
}

module attributes {stable_mosaic.version = 11 : i64} {
  func.func @_bn_finalize_kernel(%arg0: i32, %arg1: i32, %arg2: memref<8x128xf32, #tpu.memory_space<vmem>>, %arg3: memref<8x128xf32, #tpu.memory_space<vmem>>, %arg4: memref<1x128xf32, #tpu.memory_space<vmem>>, %arg5: memref<1x128xf32, #tpu.memory_space<vmem>>, %arg6: memref<1x128xf32, #tpu.memory_space<vmem>>, %arg7: memref<1x128xf32, #tpu.memory_space<vmem>>, %arg8: memref<1x128xf32, #tpu.memory_space<vmem>>, %arg9: memref<1x128xf32, #tpu.memory_space<vmem>>) attributes {dimension_semantics = [#tpu.dimension_semantics<parallel>, #tpu.dimension_semantics<arbitrary>], iteration_bounds = array<i64: 1, 2>, scalar_prefetch = 0 : i64, scratch_operands = 2 : i64, tpu.core_type = #tpu.core_type<tc>, window_params = [{transform_indices = @transform_0, window_bounds = array<i64: 8, 128>}, {transform_indices = @transform_1, window_bounds = array<i64: 8, 128>}, {transform_indices = @transform_2, window_bounds = array<i64: 1, 128>}, {transform_indices = @transform_3, window_bounds = array<i64: 1, 128>}, {transform_indices = @transform_4, window_bounds = array<i64: 1, 128>}, {transform_indices = @transform_5, window_bounds = array<i64: 1, 128>}]} {
    %c0 = arith.constant 0 : index
    %c0_0 = arith.constant 0 : index
    %0 = vector.load %arg2[%c0, %c0_0] : memref<8x128xf32, #tpu.memory_space<vmem>>, vector<8x128xf32>
    %cst = arith.constant dense<0.000000e+00> : vector<128xf32>
    %1 = vector.multi_reduction <add>, %0, %cst [0] : vector<8x128xf32> to vector<128xf32>
    %2 = vector.shape_cast %1 : vector<128xf32> to vector<1x128xf32>
    %c0_1 = arith.constant 0 : index
    %c0_2 = arith.constant 0 : index
    %3 = vector.load %arg3[%c0_1, %c0_2] : memref<8x128xf32, #tpu.memory_space<vmem>>, vector<8x128xf32>
    %cst_3 = arith.constant dense<0.000000e+00> : vector<128xf32>
    %4 = vector.multi_reduction <add>, %3, %cst_3 [0] : vector<8x128xf32> to vector<128xf32>
    %5 = vector.shape_cast %4 : vector<128xf32> to vector<1x128xf32>
    %c0_i32 = arith.constant 0 : i32
    %6 = arith.cmpi eq, %arg1, %c0_i32 : i32
    %7 = arith.extui %6 : i1 to i32
    %c0_i32_4 = arith.constant 0 : i32
    %8 = arith.cmpi ne, %7, %c0_i32_4 : i32
    scf.if %8 {
      %c0_8 = arith.constant 0 : index
      %c0_9 = arith.constant 0 : index
      %15 = vector.load %arg8[%c0_8, %c0_9] : memref<1x128xf32, #tpu.memory_space<vmem>>, vector<1x128xf32>
      tpu.vector_store %arg8[%c0_8, %c0_9], %2 {strides = array<i32>} : memref<1x128xf32, #tpu.memory_space<vmem>>, vector<1x128xf32>,
      %c0_10 = arith.constant 0 : index
      %c0_11 = arith.constant 0 : index
      %16 = vector.load %arg9[%c0_10, %c0_11] : memref<1x128xf32, #tpu.memory_space<vmem>>, vector<1x128xf32>
      tpu.vector_store %arg9[%c0_10, %c0_11], %5 {strides = array<i32>} : memref<1x128xf32, #tpu.memory_space<vmem>>, vector<1x128xf32>,
    } else {
    }
    %c0_i32_5 = arith.constant 0 : i32
    %9 = arith.cmpi sgt, %arg1, %c0_i32_5 : i32
    %10 = arith.extui %9 : i1 to i32
    %c0_i32_6 = arith.constant 0 : i32
    %11 = arith.cmpi ne, %10, %c0_i32_6 : i32
    scf.if %11 {
      %c0_8 = arith.constant 0 : index
      %c0_9 = arith.constant 0 : index
      %15 = vector.load %arg8[%c0_8, %c0_9] : memref<1x128xf32, #tpu.memory_space<vmem>>, vector<1x128xf32>
      %16 = arith.addf %15, %2 : vector<1x128xf32>
      %c0_10 = arith.constant 0 : index
      %c0_11 = arith.constant 0 : index
      %17 = vector.load %arg8[%c0_10, %c0_11] : memref<1x128xf32, #tpu.memory_space<vmem>>, vector<1x128xf32>
      tpu.vector_store %arg8[%c0_10, %c0_11], %16 {strides = array<i32>} : memref<1x128xf32, #tpu.memory_space<vmem>>, vector<1x128xf32>,
      %c0_12 = arith.constant 0 : index
      %c0_13 = arith.constant 0 : index
      %18 = vector.load %arg9[%c0_12, %c0_13] : memref<1x128xf32, #tpu.memory_space<vmem>>, vector<1x128xf32>
      %19 = arith.addf %18, %5 : vector<1x128xf32>
      %c0_14 = arith.constant 0 : index
      %c0_15 = arith.constant 0 : index
      %20 = vector.load %arg9[%c0_14, %c0_15] : memref<1x128xf32, #tpu.memory_space<vmem>>, vector<1x128xf32>
      tpu.vector_store %arg9[%c0_14, %c0_15], %19 {strides = array<i32>} : memref<1x128xf32, #tpu.memory_space<vmem>>, vector<1x128xf32>,
    } else {
    }
    %c1_i32 = arith.constant 1 : i32
    %12 = arith.cmpi eq, %arg1, %c1_i32 : i32
    %13 = arith.extui %12 : i1 to i32
    %c0_i32_7 = arith.constant 0 : i32
    %14 = arith.cmpi ne, %13, %c0_i32_7 : i32
    scf.if %14 {
      %c0_8 = arith.constant 0 : index
      %c0_9 = arith.constant 0 : index
      %15 = vector.load %arg8[%c0_8, %c0_9] : memref<1x128xf32, #tpu.memory_space<vmem>>, vector<1x128xf32>
      %cst_10 = arith.constant 9.765625E-4 : f32
      %16 = vector.broadcast %cst_10 : f32 to vector<1x128xf32>
      %17 = arith.mulf %15, %16 : vector<1x128xf32>
      %c0_11 = arith.constant 0 : index
      %c0_12 = arith.constant 0 : index
      %18 = vector.load %arg9[%c0_11, %c0_12] : memref<1x128xf32, #tpu.memory_space<vmem>>, vector<1x128xf32>
      %cst_13 = arith.constant 9.765625E-4 : f32
      %19 = vector.broadcast %cst_13 : f32 to vector<1x128xf32>
      %20 = arith.mulf %18, %19 : vector<1x128xf32>
      %21 = arith.mulf %17, %17 : vector<1x128xf32>
      %22 = arith.subf %20, %21 : vector<1x128xf32>
      %cst_14 = arith.constant 0.000000e+00 : f32
      %23 = vector.broadcast %cst_14 : f32 to vector<1x128xf32>
      %24 = arith.maximumf %22, %23 : vector<1x128xf32>
      %cst_15 = arith.constant 9.99999974E-6 : f32
      %25 = vector.broadcast %cst_15 : f32 to vector<1x128xf32>
      %26 = arith.addf %24, %25 : vector<1x128xf32>
      %27 = math.rsqrt %26 : vector<1x128xf32>
      %c0_16 = arith.constant 0 : index
      %c0_17 = arith.constant 0 : index
      %28 = vector.load %arg4[%c0_16, %c0_17] : memref<1x128xf32, #tpu.memory_space<vmem>>, vector<1x128xf32>
      %29 = arith.mulf %28, %27 : vector<1x128xf32>
      %c0_18 = arith.constant 0 : index
      %c0_19 = arith.constant 0 : index
      %30 = vector.load %arg6[%c0_18, %c0_19] : memref<1x128xf32, #tpu.memory_space<vmem>>, vector<1x128xf32>
      tpu.vector_store %arg6[%c0_18, %c0_19], %29 {strides = array<i32>} : memref<1x128xf32, #tpu.memory_space<vmem>>, vector<1x128xf32>,
      %c0_20 = arith.constant 0 : index
      %c0_21 = arith.constant 0 : index
      %31 = vector.load %arg5[%c0_20, %c0_21] : memref<1x128xf32, #tpu.memory_space<vmem>>, vector<1x128xf32>
      %32 = arith.mulf %17, %29 : vector<1x128xf32>
      %33 = arith.subf %31, %32 : vector<1x128xf32>
      %c0_22 = arith.constant 0 : index
      %c0_23 = arith.constant 0 : index
      %34 = vector.load %arg7[%c0_22, %c0_23] : memref<1x128xf32, #tpu.memory_space<vmem>>, vector<1x128xf32>
      tpu.vector_store %arg7[%c0_22, %c0_23], %33 {strides = array<i32>} : memref<1x128xf32, #tpu.memory_space<vmem>>, vector<1x128xf32>,
    } else {
    }
    return
  }
  func.func @transform_0(%arg0: i32, %arg1: i32) -> (i32, i32) {
    %c0_i32 = arith.constant 0 : i32
    return %arg1, %arg0 : i32, i32
  }
  func.func @transform_1(%arg0: i32, %arg1: i32) -> (i32, i32) {
    %c0_i32 = arith.constant 0 : i32
    return %arg1, %arg0 : i32, i32
  }
  func.func @transform_2(%arg0: i32, %arg1: i32) -> (i32, i32) {
    %c0_i32 = arith.constant 0 : i32
    %c0_i32_0 = arith.constant 0 : i32
    return %c0_i32, %arg0 : i32, i32
  }
  func.func @transform_3(%arg0: i32, %arg1: i32) -> (i32, i32) {
    %c0_i32 = arith.constant 0 : i32
    %c0_i32_0 = arith.constant 0 : i32
    return %c0_i32, %arg0 : i32, i32
  }
  func.func @transform_4(%arg0: i32, %arg1: i32) -> (i32, i32) {
    %c0_i32 = arith.constant 0 : i32
    %c0_i32_0 = arith.constant 0 : i32
    return %c0_i32, %arg0 : i32, i32
  }
  func.func @transform_5(%arg0: i32, %arg1: i32) -> (i32, i32) {
    %c0_i32 = arith.constant 0 : i32
    %c0_i32_0 = arith.constant 0 : i32
    return %c0_i32, %arg0 : i32, i32
  }
}

module attributes {stable_mosaic.version = 11 : i64} {
  func.func @_matmul_stats_kernel(%arg0: i32, %arg1: i32, %arg2: memref<64x256xbf16, #tpu.memory_space<vmem>>, %arg3: memref<256x128xbf16, #tpu.memory_space<vmem>>, %arg4: memref<64x128xbf16, #tpu.memory_space<vmem>>, %arg5: memref<8x128xf32, #tpu.memory_space<vmem>>, %arg6: memref<8x128xf32, #tpu.memory_space<vmem>>, %arg7: memref<64x128xf32, #tpu.memory_space<vmem>>) attributes {dimension_semantics = [#tpu.dimension_semantics<parallel>, #tpu.dimension_semantics<arbitrary>], iteration_bounds = array<i64: 2, 5>, scalar_prefetch = 0 : i64, scratch_operands = 1 : i64, tpu.core_type = #tpu.core_type<tc>, window_params = [{transform_indices = @transform_0, window_bounds = array<i64: 64, 256>}, {transform_indices = @transform_1, window_bounds = array<i64: 256, 128>}, {transform_indices = @transform_2, window_bounds = array<i64: 64, 128>}, {transform_indices = @transform_3, window_bounds = array<i64: 8, 128>}, {transform_indices = @transform_4, window_bounds = array<i64: 8, 128>}]} {
    %c0 = arith.constant 0 : index
    %c0_0 = arith.constant 0 : index
    %0 = vector.load %arg2[%c0, %c0_0] : memref<64x256xbf16, #tpu.memory_space<vmem>>, vector<64x256xbf16>
    %c0_1 = arith.constant 0 : index
    %c0_2 = arith.constant 0 : index
    %1 = vector.load %arg3[%c0_1, %c0_2] : memref<256x128xbf16, #tpu.memory_space<vmem>>, vector<256x128xbf16>
    %cst = arith.constant dense<0.000000e+00> : vector<64x128xf32>
    %2 = tpu.matmul %0, %1, %cst {dimension_numbers = #tpu.dot_dimension_numbers<[1], [0], [0], [1], [0, 0, 1, 1], [], []>} : vector<64x256xbf16>, vector<256x128xbf16>, vector<64x128xf32> -> vector<64x128xf32>
    %c0_i32 = arith.constant 0 : i32
    %3 = arith.cmpi eq, %arg1, %c0_i32 : i32
    %4 = arith.extui %3 : i1 to i32
    %c0_i32_3 = arith.constant 0 : i32
    %5 = arith.cmpi ne, %4, %c0_i32_3 : i32
    scf.if %5 {
      %c0_7 = arith.constant 0 : index
      %c0_8 = arith.constant 0 : index
      %12 = vector.load %arg7[%c0_7, %c0_8] : memref<64x128xf32, #tpu.memory_space<vmem>>, vector<64x128xf32>
      tpu.vector_store %arg7[%c0_7, %c0_8], %2 {strides = array<i32>} : memref<64x128xf32, #tpu.memory_space<vmem>>, vector<64x128xf32>,
    } else {
    }
    %c0_i32_4 = arith.constant 0 : i32
    %6 = arith.cmpi sgt, %arg1, %c0_i32_4 : i32
    %7 = arith.extui %6 : i1 to i32
    %c0_i32_5 = arith.constant 0 : i32
    %8 = arith.cmpi ne, %7, %c0_i32_5 : i32
    scf.if %8 {
      %c0_7 = arith.constant 0 : index
      %c0_8 = arith.constant 0 : index
      %12 = vector.load %arg7[%c0_7, %c0_8] : memref<64x128xf32, #tpu.memory_space<vmem>>, vector<64x128xf32>
      %13 = arith.addf %12, %2 : vector<64x128xf32>
      %c0_9 = arith.constant 0 : index
      %c0_10 = arith.constant 0 : index
      %14 = vector.load %arg7[%c0_9, %c0_10] : memref<64x128xf32, #tpu.memory_space<vmem>>, vector<64x128xf32>
      tpu.vector_store %arg7[%c0_9, %c0_10], %13 {strides = array<i32>} : memref<64x128xf32, #tpu.memory_space<vmem>>, vector<64x128xf32>,
    } else {
    }
    %c4_i32 = arith.constant 4 : i32
    %9 = arith.cmpi eq, %arg1, %c4_i32 : i32
    %10 = arith.extui %9 : i1 to i32
    %c0_i32_6 = arith.constant 0 : i32
    %11 = arith.cmpi ne, %10, %c0_i32_6 : i32
    scf.if %11 {
      %c0_7 = arith.constant 0 : index
      %c0_8 = arith.constant 0 : index
      %12 = vector.load %arg7[%c0_7, %c0_8] : memref<64x128xf32, #tpu.memory_space<vmem>>, vector<64x128xf32>
      %13 = arith.truncf %12 : vector<64x128xf32> to vector<64x128xbf16>
      %c0_9 = arith.constant 0 : index
      %c0_10 = arith.constant 0 : index
      %14 = vector.load %arg4[%c0_9, %c0_10] : memref<64x128xbf16, #tpu.memory_space<vmem>>, vector<64x128xbf16>
      tpu.vector_store %arg4[%c0_9, %c0_10], %13 {strides = array<i32>} : memref<64x128xbf16, #tpu.memory_space<vmem>>, vector<64x128xbf16>,
      %cst_11 = arith.constant dense<0.000000e+00> : vector<128xf32>
      %15 = vector.multi_reduction <add>, %12, %cst_11 [0] : vector<64x128xf32> to vector<128xf32>
      %16 = vector.shape_cast %15 : vector<128xf32> to vector<1x128xf32>
      %17 = arith.mulf %12, %12 : vector<64x128xf32>
      %cst_12 = arith.constant dense<0.000000e+00> : vector<128xf32>
      %18 = vector.multi_reduction <add>, %17, %cst_12 [0] : vector<64x128xf32> to vector<128xf32>
      %19 = vector.shape_cast %18 : vector<128xf32> to vector<1x128xf32>
      %20 = vector.shape_cast %16 : vector<1x128xf32> to vector<1x128xf32>
      %21 = vector.broadcast %20 : vector<1x128xf32> to vector<8x128xf32>
      %c0_13 = arith.constant 0 : index
      %c0_14 = arith.constant 0 : index
      %22 = vector.load %arg5[%c0_13, %c0_14] : memref<8x128xf32, #tpu.memory_space<vmem>>, vector<8x128xf32>
      tpu.vector_store %arg5[%c0_13, %c0_14], %21 {strides = array<i32>} : memref<8x128xf32, #tpu.memory_space<vmem>>, vector<8x128xf32>,
      %23 = vector.shape_cast %19 : vector<1x128xf32> to vector<1x128xf32>
      %24 = vector.broadcast %23 : vector<1x128xf32> to vector<8x128xf32>
      %c0_15 = arith.constant 0 : index
      %c0_16 = arith.constant 0 : index
      %25 = vector.load %arg6[%c0_15, %c0_16] : memref<8x128xf32, #tpu.memory_space<vmem>>, vector<8x128xf32>
      tpu.vector_store %arg6[%c0_15, %c0_16], %24 {strides = array<i32>} : memref<8x128xf32, #tpu.memory_space<vmem>>, vector<8x128xf32>,
    } else {
    }
    return
  }
  func.func @transform_0(%arg0: i32, %arg1: i32) -> (i32, i32) {
    %c0_i32 = arith.constant 0 : i32
    return %arg0, %arg1 : i32, i32
  }
  func.func @transform_1(%arg0: i32, %arg1: i32) -> (i32, i32) {
    %c0_i32 = arith.constant 0 : i32
    %c0_i32_0 = arith.constant 0 : i32
    return %arg1, %c0_i32 : i32, i32
  }
  func.func @transform_2(%arg0: i32, %arg1: i32) -> (i32, i32) {
    %c0_i32 = arith.constant 0 : i32
    %c0_i32_0 = arith.constant 0 : i32
    return %arg0, %c0_i32 : i32, i32
  }
  func.func @transform_3(%arg0: i32, %arg1: i32) -> (i32, i32) {
    %c0_i32 = arith.constant 0 : i32
    %c0_i32_0 = arith.constant 0 : i32
    return %arg0, %c0_i32 : i32, i32
  }
  func.func @transform_4(%arg0: i32, %arg1: i32) -> (i32, i32) {
    %c0_i32 = arith.constant 0 : i32
    %c0_i32_0 = arith.constant 0 : i32
    return %arg0, %c0_i32 : i32, i32
  }
}

module attributes {stable_mosaic.version = 11 : i64} {
  func.func @_bn_add_relu_kernel(%arg0: i32, %arg1: memref<64x128xbf16, #tpu.memory_space<vmem>>, %arg2: memref<64x128xbf16, #tpu.memory_space<vmem>>, %arg3: memref<1x128xf32, #tpu.memory_space<vmem>>, %arg4: memref<1x128xf32, #tpu.memory_space<vmem>>, %arg5: memref<1x128xf32, #tpu.memory_space<vmem>>, %arg6: memref<1x128xf32, #tpu.memory_space<vmem>>, %arg7: memref<64x128xbf16, #tpu.memory_space<vmem>>) attributes {dimension_semantics = [#tpu.dimension_semantics<parallel>], iteration_bounds = array<i64: 2>, scalar_prefetch = 0 : i64, scratch_operands = 0 : i64, tpu.core_type = #tpu.core_type<tc>, window_params = [{transform_indices = @transform_0, window_bounds = array<i64: 64, 128>}, {transform_indices = @transform_1, window_bounds = array<i64: 64, 128>}, {pipeline_mode = #tpu.pipeline_mode<synchronous>, transform_indices = @transform_2, window_bounds = array<i64: 1, 128>}, {pipeline_mode = #tpu.pipeline_mode<synchronous>, transform_indices = @transform_3, window_bounds = array<i64: 1, 128>}, {pipeline_mode = #tpu.pipeline_mode<synchronous>, transform_indices = @transform_4, window_bounds = array<i64: 1, 128>}, {pipeline_mode = #tpu.pipeline_mode<synchronous>, transform_indices = @transform_5, window_bounds = array<i64: 1, 128>}, {transform_indices = @transform_6, window_bounds = array<i64: 64, 128>}]} {
    %c0 = arith.constant 0 : index
    %c0_0 = arith.constant 0 : index
    %0 = vector.load %arg1[%c0, %c0_0] : memref<64x128xbf16, #tpu.memory_space<vmem>>, vector<64x128xbf16>
    %1 = arith.extf %0 : vector<64x128xbf16> to vector<64x128xf32>
    %c0_1 = arith.constant 0 : index
    %c0_2 = arith.constant 0 : index
    %2 = vector.load %arg3[%c0_1, %c0_2] : memref<1x128xf32, #tpu.memory_space<vmem>>, vector<1x128xf32>
    %3 = vector.broadcast %2 : vector<1x128xf32> to vector<64x128xf32>
    %4 = arith.mulf %1, %3 : vector<64x128xf32>
    %c0_3 = arith.constant 0 : index
    %c0_4 = arith.constant 0 : index
    %5 = vector.load %arg4[%c0_3, %c0_4] : memref<1x128xf32, #tpu.memory_space<vmem>>, vector<1x128xf32>
    %6 = vector.broadcast %5 : vector<1x128xf32> to vector<64x128xf32>
    %7 = arith.addf %4, %6 : vector<64x128xf32>
    %c0_5 = arith.constant 0 : index
    %c0_6 = arith.constant 0 : index
    %8 = vector.load %arg2[%c0_5, %c0_6] : memref<64x128xbf16, #tpu.memory_space<vmem>>, vector<64x128xbf16>
    %9 = arith.extf %8 : vector<64x128xbf16> to vector<64x128xf32>
    %c0_7 = arith.constant 0 : index
    %c0_8 = arith.constant 0 : index
    %10 = vector.load %arg5[%c0_7, %c0_8] : memref<1x128xf32, #tpu.memory_space<vmem>>, vector<1x128xf32>
    %11 = vector.broadcast %10 : vector<1x128xf32> to vector<64x128xf32>
    %12 = arith.mulf %9, %11 : vector<64x128xf32>
    %13 = arith.addf %7, %12 : vector<64x128xf32>
    %c0_9 = arith.constant 0 : index
    %c0_10 = arith.constant 0 : index
    %14 = vector.load %arg6[%c0_9, %c0_10] : memref<1x128xf32, #tpu.memory_space<vmem>>, vector<1x128xf32>
    %15 = vector.broadcast %14 : vector<1x128xf32> to vector<64x128xf32>
    %16 = arith.addf %13, %15 : vector<64x128xf32>
    %cst = arith.constant 0.000000e+00 : f32
    %17 = vector.broadcast %cst : f32 to vector<64x128xf32>
    %18 = arith.maximumf %16, %17 : vector<64x128xf32>
    %19 = arith.truncf %18 : vector<64x128xf32> to vector<64x128xbf16>
    %c0_11 = arith.constant 0 : index
    %c0_12 = arith.constant 0 : index
    %20 = vector.load %arg7[%c0_11, %c0_12] : memref<64x128xbf16, #tpu.memory_space<vmem>>, vector<64x128xbf16>
    tpu.vector_store %arg7[%c0_11, %c0_12], %19 {strides = array<i32>} : memref<64x128xbf16, #tpu.memory_space<vmem>>, vector<64x128xbf16>,
    return
  }
  func.func @transform_0(%arg0: i32) -> (i32, i32) {
    %c0_i32 = arith.constant 0 : i32
    %c0_i32_0 = arith.constant 0 : i32
    return %arg0, %c0_i32 : i32, i32
  }
  func.func @transform_1(%arg0: i32) -> (i32, i32) {
    %c0_i32 = arith.constant 0 : i32
    %c0_i32_0 = arith.constant 0 : i32
    return %arg0, %c0_i32 : i32, i32
  }
  func.func @transform_2(%arg0: i32) -> (i32, i32) {
    %c0_i32 = arith.constant 0 : i32
    %c0_i32_0 = arith.constant 0 : i32
    %c0_i32_1 = arith.constant 0 : i32
    return %c0_i32, %c0_i32_0 : i32, i32
  }
  func.func @transform_3(%arg0: i32) -> (i32, i32) {
    %c0_i32 = arith.constant 0 : i32
    %c0_i32_0 = arith.constant 0 : i32
    %c0_i32_1 = arith.constant 0 : i32
    return %c0_i32, %c0_i32_0 : i32, i32
  }
  func.func @transform_4(%arg0: i32) -> (i32, i32) {
    %c0_i32 = arith.constant 0 : i32
    %c0_i32_0 = arith.constant 0 : i32
    %c0_i32_1 = arith.constant 0 : i32
    return %c0_i32, %c0_i32_0 : i32, i32
  }
  func.func @transform_5(%arg0: i32) -> (i32, i32) {
    %c0_i32 = arith.constant 0 : i32
    %c0_i32_0 = arith.constant 0 : i32
    %c0_i32_1 = arith.constant 0 : i32
    return %c0_i32, %c0_i32_0 : i32, i32
  }
  func.func @transform_6(%arg0: i32) -> (i32, i32) {
    %c0_i32 = arith.constant 0 : i32
    %c0_i32_0 = arith.constant 0 : i32
    return %arg0, %c0_i32 : i32, i32
  }
}

</mosaic_0001>

<bundles_post_ra>
// kernel: basic_block1_forward.9
= control target key start
LH: loop header
LB: loop body
LE: loop exit
PB: predicated region body
PF: predicated region fallthrough
CT: control target
= control target key end

     0   :  { %s568_s18 = smov 0   ;;  %s570_s19 = smov 0   ;;  %s620_s0 = inlined_call_operand.vmem [shape: f32[16,128], index: 0, kind: input, shape index: {}]   ;;  %s621_s1 = inlined_call_operand.vmem [shape: f32[16,128], index: 1, kind: input, shape index: {}]   ;;  %s622_s2 = inlined_call_operand.vmem [shape: f32[1,128], index: 2, kind: input, shape index: {}]   ;;  %s623_s3 = inlined_call_operand.vmem [shape: f32[1,128], index: 3, kind: input, shape index: {}]   ;;  %s624_s4 = inlined_call_operand.vmem [shape: f32[1,128], index: 4, kind: output, shape index: {0}]   ;;  %s625_s5 = inlined_call_operand.vmem [shape: f32[1,128], index: 5, kind: output, shape index: {1}]  }
   0x1   :  { %s572_s20 = smov 0  }
   0x2 LB: > { %s25_s21 = sadd.s32 1, %s532_s19  ;;  %p478_p0 = scmp.ge.s32.totalorder %s536_s20, 1  ;;  %s536_s20 = sphi %s572_s20, %s16_s20   ;;  %s532_s19 = sphi %s570_s19, %s627_s19   ;;  %s528_s18 = sphi %s568_s18, %s626_s18  }
   0x3   : > { %p26_p1 = scmp.ge.s32.totalorder %s25_s21, 2  ;;  %p236_p2 = scmp.lt.s32.totalorder %s536_s20, 3 }
   0x5   : > { %s629_s21 = smov (%p26_p1, %s25_s21), 0  ;;  %p237_p3 = pnand %p478_p0, %p236_p2 }
   0x6   : > { %p280_p4 = scmp.lt.s32.totalorder (!%p237_p3), %s528_s18, 1  ;;  %p481_p5 = scmp.ne.s32.totalorder (!%p237_p3), %s528_s18, 0 }
   0x7   : > { %240 = sbr.rel (%p237_p3) target bundleno = 79 (0x4f), region = 36 }
   0xe   : > { %s281_s22 = scalar_select %p280_p4, %s528_s18, 1 }
  0x10   : > { %s479_s23 = sshll.u32 %s281_s22, 3 }
  0x11   : > { %s286_s26 = scalar_lea.vmem %s620_s0, %s479_s23  ;;  %s293_s29 = scalar_lea.vmem %s621_s1, %s479_s23 }
  0x12   : > { %v306_v0 = vld [vmem:[%s286_s26] sm:$0xff] }
  0x13   : > { %v313_v1 = vld [vmem:[%s293_s29] sm:$0xff]  ;;  %v307_v2 = vrot.slane %v306_v0, 4 }
  0x14   : > { %v314_v3 = vrot.slane %v313_v1, 4 }
  0x15   : > { %v308_v4 = vadd.f32 %v307_v2, %v306_v0 }
  0x16   : > { %v315_v5 = vadd.f32 %v314_v3, %v313_v1 }
  0x17   : > { %v309_v6 = vrot.slane %v308_v4, 2 }
  0x18   : > { %v316_v7 = vrot.slane %v315_v5, 2  ;;  %323 = sbr.rel (%p481_p5) target bundleno = 33 (0x21), region = 40 }
  0x19   : > { %v310_v8 = vadd.f32 %v309_v6, %v308_v4 }
  0x1a   : > { %v317_v9 = vadd.f32 %v316_v7, %v315_v5 }
  0x1b   : > { %v311_v10 = vrot.slane %v310_v8, 1 }
  0x1c   : > { %v318_v11 = vrot.slane %v317_v9, 1 }
  0x1d   : > { %v312_v12 = vadd.f32 %v311_v10, %v310_v8 }
  0x1e   : > { %v319_v13 = vadd.f32 %v318_v11, %v317_v9 }
  0x1f   : > { %324 = vst [vmem:[#allocation2] sm:$0x1] %v312_v12 }
  0x20   : > { %325 = vst [vmem:[#allocation3] sm:$0x1] %v319_v13 }
  0x21 PF: > { %p482_p6 = scmp.le.s32.totalorder %s528_s18, 0 }
  0x23   : > { %329 = sbr.rel (%p482_p6) target bundleno = 44 (0x2c), region = 44 }
  0x27   : > { %v333_v15 = vld [vmem:[#allocation3] sm:$0x1] (!%p482_p6) }
  0x28   : > { %v330_v14 = vld [vmem:[#allocation2] sm:$0x1] (!%p482_p6)  ;;  %v334_v17 = vadd.f32 (!%p482_p6), %v333_v15, %v319_v13 }
  0x29   : > { %v331_v16 = vadd.f32 (!%p482_p6), %v330_v14, %v312_v12 }
  0x2a   : > { %335 = vst [vmem:[#allocation3] sm:$0x1] %v334_v17 }
  0x2b   : > { %332 = vst [vmem:[#allocation2] sm:$0x1] %v331_v16 }
  0x2c PF: > { %p483_p7 = scmp.ne.s32.totalorder %s528_s18, 1 }
  0x2d   : > { %v349_v26 = vld [vmem:[%s622_s2] sm:$0x1] (!%p483_p7) }
  0x2e   : > { %339 = sbr.rel (%p483_p7) target bundleno = 79 (0x4f), region = 48  ;;  %v352_v29 = vld [vmem:[%s623_s3] sm:$0x1] (!%p483_p7) }
  0x32   : > { %v340_v18 = vld [vmem:[#allocation2] sm:$0x1] (!%p483_p7) }
  0x33   : > { %v342_v19 = vld [vmem:[#allocation3] sm:$0x1] (!%p483_p7)  ;;  %v341_v20 = vmul.f32 (!%p483_p7), 0.0009765625, %v340_v18 }
  0x34   : > { %v343_v21 = vmul.f32 (!%p483_p7), 0.0009765625, %v342_v19 }
  0x35   : > { %v344_v22 = vmul.f32 %v341_v20, %v341_v20 }
  0x37   : > { %v345_v23 = vsub.f32 %v343_v21, %v344_v22 }
  0x39   : > { %v346_v24 = vmax.f32 %v345_v23, 0.0 }
  0x3b   : > { %v347_v25 = vadd.f32 1e-05, %v346_v24 }
  0x3d   : > { %512 = vrsqrt.f32 %v347_v25 }
  0x47   : > { %v513_v27 = vpop.eup %512 }
  0x48   : > { %v350_v28 = vmul.f32 %v513_v27, %v349_v26 }
  0x4a   : > { %351 = vst [vmem:[%s624_s4] sm:$0x1] %v350_v28  ;;  %v353_v30 = vmul.f32 %v350_v28, %v341_v20 }
  0x4c   : > { %v354_v31 = vsub.f32 %v352_v29, %v353_v30 }
  0x4e   : > { %355 = vst [vmem:[%s625_s5] sm:$0x1] %v354_v31 }
  0x4f PF: > { %s16_s20 = sadd.s32 1, %s536_s20   ;;  %s626_s18 = smov %s532_s19 }
  0x50   : > { %p13_p8 = scmp.ge.s32.totalorder %s16_s20, 4   ;;  %s627_s19 = smov %s629_s21 }
  0x52   :  { %15 = sbr.rel (!%p13_p8) target bundleno = 2 (0x2), region = 99 }

// kernel: basic_block1_forward.10
= control target key start
LH: loop header
LB: loop body
LE: loop exit
PB: predicated region body
PF: predicated region fallthrough
CT: control target
= control target key end

     0   :  { %s431_s12 = smov 0   ;;  %s461_s0 = inlined_call_operand.vmem [shape: bf16[128,128], index: 0, kind: input, shape index: {}]   ;;  %s462_s1 = inlined_call_operand.vmem [shape: f32[1,128], index: 1, kind: input, shape index: {}]   ;;  %s463_s2 = inlined_call_operand.vmem [shape: f32[1,128], index: 2, kind: input, shape index: {}]   ;;  %s464_s3 = inlined_call_operand.vmem [shape: bf16[128,128], index: 3, kind: output, shape index: {}]  }
   0x1 LB: > { %s324_s13 = sadd.s32 4294967295, %s409_s12   ;;  %p328_p0 = scmp.ge.s32.totalorder %s409_s12, 1  ;;  %s409_s12 = sphi %s431_s12, %s13_s12  }
   0x2   : > { %p138_p1 = scmp.lt.s32.totalorder %s409_s12, 3 }
   0x4   : > { %p139_p2 = pnand %p328_p0, %p138_p1 }
   0x5   : > { %s329_s14 = sshll.u32 (!%p139_p2), %s324_s13, 3  ;;  %v333_v0 = vld [vmem:[%s462_s1] ss:$0 sm:$0xff] (!%p139_p2) }
   0x6   : > { %142 = sbr.rel (%p139_p2) target bundleno = 29 (0x1d), region = 32  ;;  %p163_p3 = scmp.lt.s32.totalorder (!%p139_p2), %s329_s14, 15  ;;  %v334_v9 = vld [vmem:[%s463_s2] ss:$0 sm:$0xff] (!%p139_p2) }
   0xd   : > { %s466_s14 = smov (!%p163_p3, %s329_s14), 15 }
   0xe   : > { %s330_s15 = sshll.u32 %s466_s14, 2 }
   0xf   : > { %s166_s18 = scalar_lea.vmem %s461_s0, %s330_s15  ;;  %s172_s25 = scalar_lea.vmem %s464_s3, %s330_s15 }
  0x10   : > { %v354_v1 = vld [vmem:[%s166_s18] sm:$0xff]   ;;  %v389_v2 = vld [vmem:[%s166_s18 + $0x8] sm:$0xff]   ;;  %v390_v3 = vld [vmem:[%s166_s18 + $0x10] sm:$0xff]  }
  0x11   : > { %v355_v4 = vunpack.c.l.bf16 %v354_v1  ;;  %v356_v5 = vunpack.c.h.bf16 %v354_v1  ;;  %v359_v6 = vunpack.c.l.bf16 %v389_v2  ;;  %v360_v7 = vunpack.c.h.bf16 %v389_v2  ;;  %v391_v8 = vld [vmem:[%s166_s18 + $0x18] sm:$0xff]  }
  0x12   : > { %v363_v10 = vunpack.c.l.bf16 %v390_v3  ;;  %v364_v11 = vunpack.c.h.bf16 %v390_v3  ;;  %v367_v12 = vunpack.c.l.bf16 %v391_v8  ;;  %v368_v13 = vunpack.c.h.bf16 %v391_v8 }
  0x13   : > { %v197_v14 = vmul.f32 %v355_v4, %v333_v0  ;;  %v198_v15 = vmul.f32 %v356_v5, %v333_v0  ;;  %v199_v16 = vmul.f32 %v359_v6, %v333_v0  ;;  %v200_v17 = vmul.f32 %v360_v7, %v333_v0 }
  0x14   : > { %v201_v18 = vmul.f32 %v363_v10, %v333_v0  ;;  %v202_v19 = vmul.f32 %v364_v11, %v333_v0  ;;  %v203_v20 = vmul.f32 %v367_v12, %v333_v0  ;;  %v204_v21 = vmul.f32 %v368_v13, %v333_v0 }
  0x15   : > { %v212_v22 = vadd.f32 %v334_v9, %v197_v14  ;;  %v213_v23 = vadd.f32 %v334_v9, %v198_v15  ;;  %v214_v24 = vadd.f32 %v334_v9, %v199_v16  ;;  %v215_v25 = vadd.f32 %v334_v9, %v200_v17 }
  0x16   : > { %v216_v26 = vadd.f32 %v334_v9, %v201_v18  ;;  %v217_v27 = vadd.f32 %v334_v9, %v202_v19  ;;  %v218_v28 = vadd.f32 %v334_v9, %v203_v20  ;;  %v219_v29 = vadd.f32 %v334_v9, %v204_v21 }
  0x17   : > { %v220_v30 = vmax.f32 %v212_v22, 0.0  ;;  %v221_v31 = vmax.f32 %v213_v23, 0.0  ;;  %v222_v32 = vmax.f32 %v214_v24, 0.0  ;;  %v223_v33 = vmax.f32 %v215_v25, 0.0 }
  0x18   : > { %v224_v34 = vmax.f32 %v216_v26, 0.0  ;;  %v225_v35 = vmax.f32 %v217_v27, 0.0  ;;  %v226_v36 = vmax.f32 %v218_v28, 0.0  ;;  %v227_v37 = vmax.f32 %v219_v29, 0.0 }
  0x19   : > { %v372_v38 = vpack.c.bf16 %v221_v31, %v220_v30  ;;  %v377_v39 = vpack.c.bf16 %v223_v33, %v222_v32 }
  0x1a   : > { %v382_v40 = vpack.c.bf16 %v225_v35, %v224_v34  ;;  %v387_v41 = vpack.c.bf16 %v227_v37, %v226_v36 }
  0x1b   : > { %373 = vst [vmem:[%s172_s25] sm:$0xff] %v372_v38   ;;  %392 = vst [vmem:[%s172_s25 + $0x8] sm:$0xff] %v377_v39  }
  0x1c   : > { %393 = vst [vmem:[%s172_s25 + $0x10] sm:$0xff] %v382_v40   ;;  %394 = vst [vmem:[%s172_s25 + $0x18] sm:$0xff] %v387_v41  }
  0x1d PF: > { %s13_s12 = sadd.s32 1, %s409_s12  }
  0x1e   : > { %p10_p4 = scmp.ge.s32.totalorder %s13_s12, 4  }
  0x20   :  { %12 = sbr.rel (!%p10_p4) target bundleno = 1 (0x1), region = 62 }

// kernel: basic_block1_forward.8
= control target key start
LH: loop header
LB: loop body
LE: loop exit
PB: predicated region body
PF: predicated region fallthrough
CT: control target
= control target key end

     0   :  { %s903_s15 = smov 0   ;;  %s905_s16 = smov 0   ;;  %s984_s0 = inlined_call_operand.vmem [shape: bf16[128,128], index: 0, kind: input, shape index: {}]   ;;  %s985_s1 = inlined_call_operand.vmem [shape: bf16[128,128], index: 1, kind: input, shape index: {}]   ;;  %s986_s2 = inlined_call_operand.vmem [shape: bf16[128,128], index: 2, kind: output, shape index: {0}]   ;;  %s987_s3 = inlined_call_operand.vmem [shape: f32[16,128], index: 3, kind: output, shape index: {1}]   ;;  %s988_s4 = inlined_call_operand.vmem [shape: f32[16,128], index: 4, kind: output, shape index: {2}]  }
   0x1   :  { %s907_s17 = smov 0  }
   0x2 LB: > { %s27_s18 = sadd.s32 1, %s872_s16  ;;  %p706_p0 = scmp.ge.s32.totalorder %s876_s17, 1  ;;  %s876_s17 = sphi %s907_s17, %s15_s17   ;;  %s872_s16 = sphi %s905_s16, %s990_s16   ;;  %s868_s15 = sphi %s903_s15, %s989_s15  }
   0x3   : > { %p29_p1 = scmp.ge.s32.totalorder %s27_s18, 2  ;;  %p196_p2 = scmp.lt.s32.totalorder %s876_s17, 3 }
   0x5   : > { %s992_s18 = smov (%p29_p1, %s27_s18), 0  ;;  %p197_p3 = pnand %p706_p0, %p196_p2 }
   0x6   : > { %v842_v0 = vld [vmem:[%s985_s1] sm:$0xff] (!%p197_p3)   ;;  %s707_s21 = sshll.u32 (!%p197_p3), %s868_s15, 3  ;;  %v843_v1 = vld [vmem:[%s985_s1 + $0x8] sm:$0xff] (!%p197_p3)   ;;  %v844_v2 = vld [vmem:[%s985_s1 + $0x10] sm:$0xff] (!%p197_p3)   ;;  %p259_p5 = scmp.lt.s32.totalorder (!%p197_p3), %s868_s15, 1 }
   0x7   : > { %200 = sbr.rel (%p197_p3) target bundleno = 283 (0x11b), region = 28  ;;  %p239_p4 = scmp.lt.s32.totalorder (!%p197_p3), %s707_s21, 15  ;;  %778 = vmatprep.subr.bf16.mxu0 (!%p197_p3), %v842_v0  ;;  %802 = vmatprep.subr.bf16.mxu1 (!%p197_p3), %v842_v0  ;;  %v845_v3 = vld [vmem:[%s985_s1 + $0x18] sm:$0xff] (!%p197_p3)   ;;  %v846_v6 = vld [vmem:[%s985_s1 + $0x20] sm:$0xff] (!%p197_p3)   ;;  %v847_v7 = vld [vmem:[%s985_s1 + $0x28] sm:$0xff] (!%p197_p3)  }
   0x8   : > { %779 = vmatpush3.bf16.msra.mxu0 (!%p197_p3), %v842_v0  ;;  %810 = vmatpush3.bf16.msra.mxu1 (!%p197_p3), %v842_v0  ;;  %v848_v8 = vld [vmem:[%s985_s1 + $0x30] sm:$0xff] (!%p197_p3)   ;;  %v849_v9 = vld [vmem:[%s985_s1 + $0x38] sm:$0xff] (!%p197_p3)  }
   0x9   : > { %780 = vmatprep.subr.bf16.mxu0 (!%p197_p3), %v843_v1  ;;  %803 = vmatprep.subr.bf16.mxu1 (!%p197_p3), %v843_v1 }
   0xc   : > { %781 = vmatpush3.bf16.msra.mxu0 (!%p197_p3), %v843_v1  ;;  %811 = vmatpush3.bf16.msra.mxu1 (!%p197_p3), %v843_v1 }
   0xd   : > { %782 = vmatprep.subr.bf16.mxu0 (!%p197_p3), %v844_v2  ;;  %804 = vmatprep.subr.bf16.mxu1 (!%p197_p3), %v844_v2 }
   0xe   : > { %s994_s21 = smov (!%p239_p4, %s707_s21), 15  ;;  %s996_s15 = smov (!%p259_p5, %s868_s15), 1 }
   0xf   : > { %s708_s26 = sshll.u32 %s994_s21, 2  ;;  %s711_s21 = sshll.u32 %s996_s15, 3 }
  0x10   : > { %s941_s29 = scalar_lea.vmem %s984_s0, %s708_s26  ;;  %783 = vmatpush3.bf16.msra.mxu0 %v844_v2  ;;  %812 = vmatpush3.bf16.msra.mxu1 %v844_v2  ;;  %s257_s20 = scalar_lea.vmem %s986_s2, %s708_s26 }
  0x11   : > { %v850_v4 = vld [vmem:[%s941_s29] sm:$0xff]   ;;  %v852_v5 = vld [vmem:[%s941_s29 + $0x10] sm:$0xff]   ;;  %784 = vmatprep.subr.bf16.mxu0 %v845_v3  ;;  %805 = vmatprep.subr.bf16.mxu1 %v845_v3  ;;  %v851_v10 = vld [vmem:[%s941_s29 + $0x8] sm:$0xff]   ;;  %s262_s24 = scalar_lea.vmem %s987_s3, %s711_s21  ;;  %s266_s27 = scalar_lea.vmem %s988_s4, %s711_s21 }
  0x12   : > { %794 = vmatprep.mubr.bf16.mxu0 %v850_v4  ;;  %798 = vmatprep.mubr.bf16.mxu1 %v852_v5  ;;  %v853_v11 = vld [vmem:[%s941_s29 + $0x18] sm:$0xff]  }
  0x14   : > { %785 = vmatpush3.bf16.msra.mxu0 %v845_v3  ;;  %813 = vmatpush3.bf16.msra.mxu1 %v845_v3 }
  0x15   : > { %786 = vmatprep.subr.bf16.mxu0 %v846_v6  ;;  %806 = vmatprep.subr.bf16.mxu1 %v846_v6 }
  0x18   : > { %787 = vmatpush3.bf16.msra.mxu0 %v846_v6  ;;  %814 = vmatpush3.bf16.msra.mxu1 %v846_v6 }
  0x19   : > { %788 = vmatprep.subr.bf16.mxu0 %v847_v7  ;;  %807 = vmatprep.subr.bf16.mxu1 %v847_v7 }
  0x1c   : > { %789 = vmatpush3.bf16.msra.mxu0 %v847_v7  ;;  %815 = vmatpush3.bf16.msra.mxu1 %v847_v7 }
  0x1d   : > { %790 = vmatprep.subr.bf16.mxu0 %v848_v8  ;;  %808 = vmatprep.subr.bf16.mxu1 %v848_v8 }
  0x20   : > { %791 = vmatpush3.bf16.msra.mxu0 %v848_v8  ;;  %816 = vmatpush3.bf16.msra.mxu1 %v848_v8 }
  0x21   : > { %792 = vmatprep.subr.bf16.mxu0 %v849_v9  ;;  %809 = vmatprep.subr.bf16.mxu1 %v849_v9 }
  0x24   : > { %793 = vmatpush3.bf16.msra.mxu0 %v849_v9  ;;  %817 = vmatpush3.bf16.msra.mxu1 %v849_v9 }
  0x27   : > { %795 = vmatmul.mubr.bf16.vlgmr.msra.gmra.mrb[0].mxu0 %v851_v10  ;;  %799 = vmatmul.mubr.bf16.vlgmr.msra.gmra.mrb[0].mxu1 %v853_v11 }
  0xfa   : > { %v796_v12 = vpop.f32.mrb[0].mxu0  ;;  %v800_v13 = vpop.f32.mrb[0].mxu1 }
  0xfb   : > { %v398_v14 = vpop.f32.mrb[1].mxu0  ;;  %v414_v15 = vpop.f32.mrb[1].mxu1  ;;  %v535_v27 = vmul.f32 %v796_v12, %v796_v12  ;;  %v539_v39 = vmul.f32 %v800_v13, %v800_v13 }
  0xfc   : > { %v797_v16 = vpop.f32.mrb[2].mxu0  ;;  %v801_v17 = vpop.f32.mrb[2].mxu1  ;;  %v533_v18 = vmul.f32 %v398_v14, %v398_v14  ;;  %v537_v33 = vmul.f32 %v414_v15, %v414_v15 }
  0xfd   : > { %v751_v19 = vpack.c.bf16 %v797_v16, %v796_v12  ;;  %v401_v20 = vpop.f32.mrb[3].mxu0  ;;  %v761_v21 = vpack.c.bf16 %v801_v17, %v800_v13  ;;  %v417_v22 = vpop.f32.mrb[3].mxu1  ;;  %v536_v30 = vmul.f32 %v797_v16, %v797_v16  ;;  %v540_v42 = vmul.f32 %v801_v17, %v801_v17 }
  0xfe   : > { %v746_v23 = vpack.c.bf16 %v401_v20, %v398_v14  ;;  %v520_v24 = vadd.f32 %v401_v20, %v398_v14  ;;  %v534_v25 = vmul.f32 %v401_v20, %v401_v20  ;;  %v756_v26 = vpack.c.bf16 %v417_v22, %v414_v15 }
  0xff   : > { %763 = vst [vmem:[%s257_s20 + $0x8] sm:$0xff] %v751_v19   ;;  %765 = vst [vmem:[%s257_s20 + $0x18] sm:$0xff] %v761_v21   ;;  %v538_v38 = vmul.f32 %v417_v22, %v417_v22 }
 0x100   : > { %747 = vst [vmem:[%s257_s20] sm:$0xff] %v746_v23   ;;  %v521_v28 = vadd.f32 %v796_v12, %v520_v24  ;;  %v541_v29 = vadd.f32 %v534_v25, %v533_v18  ;;  %764 = vst [vmem:[%s257_s20 + $0x10] sm:$0xff] %v756_v26  }
 0x102   : > { %v542_v31 = vadd.f32 %v541_v29, %v535_v27  ;;  %v522_v32 = vadd.f32 %v797_v16, %v521_v28 }
 0x104   : > { %v523_v34 = vadd.f32 %v522_v32, %v414_v15  ;;  %v543_v35 = vadd.f32 %v542_v31, %v536_v30 }
 0x106   : > { %v544_v36 = vadd.f32 %v543_v35, %v537_v33  ;;  %v524_v37 = vadd.f32 %v523_v34, %v417_v22 }
 0x108   : > { %v525_v40 = vadd.f32 %v800_v13, %v524_v37  ;;  %v545_v41 = vadd.f32 %v544_v36, %v538_v38 }
 0x10a   : > { %v526_v43 = vadd.f32 %v801_v17, %v525_v40  ;;  %v546_v44 = vadd.f32 %v545_v41, %v539_v39 }
 0x10c   : > { %v527_v45 = vrot.slane %v526_v43, 4  ;;  %v547_v46 = vadd.f32 %v546_v44, %v540_v42 }
 0x10e   : > { %v528_v47 = vadd.f32 %v527_v45, %v526_v43  ;;  %v548_v48 = vrot.slane %v547_v46, 4 }
 0x110   : > { %v529_v49 = vrot.slane %v528_v47, 2  ;;  %v549_v50 = vadd.f32 %v548_v48, %v547_v46 }
 0x112   : > { %v530_v51 = vadd.f32 %v529_v49, %v528_v47  ;;  %v550_v52 = vrot.slane %v549_v50, 2 }
 0x114   : > { %v531_v53 = vrot.slane %v530_v51, 1  ;;  %v551_v54 = vadd.f32 %v550_v52, %v549_v50 }
 0x116   : > { %v532_v55 = vadd.f32 %v531_v53, %v530_v51  ;;  %v552_v56 = vrot.slane %v551_v54, 1 }
 0x118   : > { %v553_v57 = vadd.f32 %v552_v56, %v551_v54  ;;  %554 = vst [vmem:[%s262_s24] sm:$0xff] %v532_v55 }
 0x11a   : > { %555 = vst [vmem:[%s266_s27] sm:$0xff] %v553_v57 }
 0x11b PF: > { %s15_s17 = sadd.s32 1, %s876_s17   ;;  %s989_s15 = smov %s872_s16 }
 0x11c   : > { %p12_p6 = scmp.ge.s32.totalorder %s15_s17, 4   ;;  %s990_s16 = smov %s992_s18 }
 0x11e   :  { %14 = sbr.rel (!%p12_p6) target bundleno = 2 (0x2), region = 97 }

// kernel: basic_block1_forward.13
= control target key start
LH: loop header
LB: loop body
LE: loop exit
PB: predicated region body
PF: predicated region fallthrough
CT: control target
= control target key end

     0   :  { %s1152_s15 = smov 0   ;;  %s1154_s16 = smov 0   ;;  %s1295_s0 = inlined_call_operand.vmem [shape: bf16[128,1280], index: 0, kind: input, shape index: {}]   ;;  %s1296_s1 = inlined_call_operand.vmem [shape: bf16[1280,128], index: 1, kind: input, shape index: {}]   ;;  %s1297_s2 = inlined_call_operand.vmem [shape: bf16[128,128], index: 2, kind: output, shape index: {0}]   ;;  %s1298_s3 = inlined_call_operand.vmem [shape: f32[16,128], index: 3, kind: output, shape index: {1}]   ;;  %s1299_s4 = inlined_call_operand.vmem [shape: f32[16,128], index: 4, kind: output, shape index: {2}]  }
   0x1   :  { %s1156_s17 = smov 0   ;;  %s1158_s18 = smov 0  }
   0x2   :  { %s1160_s19 = smov 0   ;;  %s1162_s20 = smov 0  }
   0x3   :  { %s1164_s21 = smov 0  }
   0x4 LB: > { %s24_s22 = sadd.s32 1, %s1117_s19  ;;  %s27_s23 = sadd.s32 1, %s1121_s20  ;;  %s1125_s21 = sphi %s1164_s21, %s15_s21   ;;  %s1121_s20 = sphi %s1162_s20, %s1305_s20   ;;  %s1117_s19 = sphi %s1160_s19, %s1304_s19   ;;  %s1113_s18 = sphi %s1158_s18, %s1303_s18   ;;  %s1109_s17 = sphi %s1156_s17, %s1302_s17   ;;  %s1105_s16 = sphi %s1154_s16, %s1301_s16   ;;  %s1101_s15 = sphi %s1152_s15, %s1300_s15  }
   0x5   : > { %p25_p0 = scmp.ge.s32.totalorder %s24_s22, 5  ;;  %p43_p1 = scmp.ne.s32.totalorder %s1105_s16, %s1101_s15 }
   0x6   : > { %p44_p2 = scmp.eq.s32.totalorder %s1125_s21, 0  ;;  %s36_s27 = sadd.s32 1, %s1105_s16 }
   0x7   : > { %s1307_s22 = smov (%p25_p0, %s24_s22), 0  ;;  %s1309_s23 = smov (!%p25_p0, %s27_s23), %s1121_s20 }
   0x8   : > { %p45_p3 = por %p44_p2, %p43_p1  ;;  %p29_p4 = scmp.ge.s32.totalorder %s1309_s23, 2 }
   0x9   : > { %s32_s24 = ssub.s32 %s1117_s19, %s1307_s22  ;;  %p848_p6 = scmp.ge.s32.totalorder %s1125_s21, 10 }
   0xa   : > { %s1311_s23 = smov (%p29_p4, %s1309_s23), 0 }
   0xb   : > { %s31_s25 = ssub.s32 %s1121_s20, %s1311_s23  ;;  %173 = sbr.rel (%p848_p6) target bundleno = 30 (0x1e), region = 16 }
   0xc   : > { %s33_s26 = sor.u32 %s32_s24, %s31_s25 }
   0xd   : > { %p34_p5 = scmp.eq.s32.totalorder %s33_s26, 0 }
   0xf   : > { %s1203_s28 = scalar_select %p34_p5, %s1105_s16, %s36_s27  }
  0x12   : > { %176 = sbr.rel (!%p45_p3) target bundleno = 30 (0x1e), region = 20  ;;  %s178_s29 = sand.u32 (%p45_p3), 1, %s1105_s16  }
  0x13   : > { %s851_s30 = sshll.u32 (%p45_p3), %s1117_s19, 1  ;;  %s849_s5 = sshll.u32 (%p45_p3), %s178_s29, 6 }
  0x14   : > { %s986_s6 = smul.u32 (%p45_p3), 80, %s1121_s20  ;;  %s180_s12 = scalar_lea.vmem (%p45_p3), [#allocation3], %s849_s5 }
  0x16   : > { %s184_s7 = sadd.s32 (%p45_p3), %s986_s6, %s851_s30 }
  0x17   : > { %s853_s8 = sshll.u32 (%p45_p3), %s184_s7, 2 }
  0x18   : > { %s186_s11 = scalar_lea.vmem (%p45_p3), %s1295_s0, %s853_s8 }
  0x19   : > { %v228_v0 = vld [vmem:[%s186_s11] sm:$0xff]  ;;  %v230_v1 = vld [vmem:[%s186_s11 + $0x28] sm:$0xff]  ;;  %v232_v2 = vld [vmem:[%s186_s11 + $0x50] sm:$0xff] }
  0x1a   : > { %229 = vst [vmem:[%s180_s12] sm:$0xff] %v228_v0  ;;  %231 = vst [vmem:[%s180_s12 + $0x8] sm:$0xff] %v230_v1  ;;  %v234_v3 = vld [vmem:[%s186_s11 + $0x78] sm:$0xff]  ;;  %v236_v4 = vld [vmem:[%s186_s11 + $0xa0] sm:$0xff] }
  0x1b   : > { %233 = vst [vmem:[%s180_s12 + $0x10] sm:$0xff] %v232_v2  ;;  %v238_v5 = vld [vmem:[%s186_s11 + $0xc8] sm:$0xff]  ;;  %235 = vst [vmem:[%s180_s12 + $0x18] sm:$0xff] %v234_v3  ;;  %v240_v6 = vld [vmem:[%s186_s11 + $0xf0] sm:$0xff] }
  0x1c   : > { %237 = vst [vmem:[%s180_s12 + $0x20] sm:$0xff] %v236_v4  ;;  %239 = vst [vmem:[%s180_s12 + $0x28] sm:$0xff] %v238_v5  ;;  %v242_v7 = vld [vmem:[%s186_s11 + $0x118] sm:$0xff] }
  0x1d   : > { %241 = vst [vmem:[%s180_s12 + $0x30] sm:$0xff] %v240_v6  ;;  %243 = vst [vmem:[%s180_s12 + $0x38] sm:$0xff] %v242_v7 }
  0x1e PF: > { %p854_p7 = scmp.ge.s32.totalorder %s1125_s21, 1  ;;  %p257_p8 = scmp.lt.s32.totalorder %s1125_s21, 11 }
  0x20   : > { %p258_p9 = pnand %p854_p7, %p257_p8 }
  0x21   : > { %s856_s13 = sshll.u32 (!%p258_p9), %s1109_s17, 5  ;;  %s858_s14 = sshll.u32 (!%p258_p9), %s1113_s18, 3 }
  0x22   : > { %261 = sbr.rel (%p258_p9) target bundleno = 349 (0x15d), region = 62  ;;  %p305_p10 = scmp.lt.s32.totalorder (!%p258_p9), %s856_s13, 159 }
  0x23   : > { %p311_p11 = scmp.lt.s32.totalorder (!%p258_p9), %s858_s14, 15  ;;  %p316_p12 = scmp.lt.s32.totalorder (!%p258_p9), %s1113_s18, 1 }
  0x24   : > { %p886_p13 = scmp.ne.s32.totalorder (!%p258_p9), %s1109_s17, 0 }
  0x29   : > { %s1313_s13 = smov (!%p305_p10, %s856_s13), 159  ;;  %s1315_s14 = smov (!%p311_p11, %s858_s14), 15 }
  0x2a   : > { %s857_s24 = sshll.u32 %s1313_s13, 2  ;;  %s859_s29 = sshll.u32 %s1315_s14, 2 }
  0x2b   : > { %s1220_s27 = scalar_lea.vmem %s1296_s1, %s857_s24  ;;  %s1225_s6 = scalar_lea.vmem %s1297_s2, %s859_s29 }
  0x2c   : > { %v1043_v8 = vld [vmem:[%s1220_s27 + $0x40] sm:$0xff]   ;;  %s1317_s18 = smov (!%p316_p12, %s1113_s18), 1  ;;  %v1045_v10 = vld [vmem:[%s1220_s27 + $0x48] sm:$0xff]   ;;  %v1047_v12 = vld [vmem:[%s1220_s27 + $0x50] sm:$0xff]  }
  0x2d   : > { %v1044_v9 = vld [vmem:[%s1220_s27] sm:$0xff]   ;;  %930 = vmatprep.subr.bf16.mxu0 %v1043_v8  ;;  %970 = vmatprep.subr.bf16.mxu1 %v1043_v8  ;;  %s860_s7 = sshll.u32 %s1317_s18, 3  ;;  %v1046_v11 = vld [vmem:[%s1220_s27 + $0x8] sm:$0xff]   ;;  %v1048_v13 = vld [vmem:[%s1220_s27 + $0x10] sm:$0xff]   ;;  %s264_s18 = sand.u32 1, %s1101_s15  }
  0x2e   : > { %931 = vmatpush3.bf16.msra.mxu0 %v1044_v9  ;;  %978 = vmatpush3.bf16.msra.mxu1 %v1044_v9  ;;  %s1235_s10 = scalar_lea.vmem %s1298_s3, %s860_s7  ;;  %s1240_s13 = scalar_lea.vmem %s1299_s4, %s860_s7  ;;  %v1049_v14 = vld [vmem:[%s1220_s27 + $0x58] sm:$0xff]   ;;  %v1051_v16 = vld [vmem:[%s1220_s27 + $0x60] sm:$0xff]   ;;  %v1053_v18 = vld [vmem:[%s1220_s27 + $0x68] sm:$0xff]  }
  0x2f   : > { %932 = vmatprep.subr.bf16.mxu0 %v1045_v10  ;;  %971 = vmatprep.subr.bf16.mxu1 %v1045_v10  ;;  %v1050_v15 = vld [vmem:[%s1220_s27 + $0x18] sm:$0xff]   ;;  %s855_s14 = sshll.u32 %s264_s18, 6  ;;  %v1052_v17 = vld [vmem:[%s1220_s27 + $0x20] sm:$0xff]   ;;  %v1054_v21 = vld [vmem:[%s1220_s27 + $0x28] sm:$0xff]  }
  0x30   : > { %s1250_s24 = scalar_lea.vmem [#allocation3], %s855_s14  ;;  %v1055_v22 = vld [vmem:[%s1220_s27 + $0x70] sm:$0xff]   ;;  %v1057_v24 = vld [vmem:[%s1220_s27 + $0x78] sm:$0xff]  }
  0x31   : > { %v1061_v19 = vld [vmem:[%s1250_s24 + $0x4] ss:$8 sps:$4 sm:$0xff]   ;;  %v1056_v23 = vld [vmem:[%s1220_s27 + $0x30] sm:$0xff]   ;;  %v1058_v25 = vld [vmem:[%s1220_s27 + $0x38] sm:$0xff]  }
  0x32   : > { %933 = vmatpush3.bf16.msra.mxu0 %v1046_v11  ;;  %979 = vmatpush3.bf16.msra.mxu1 %v1046_v11  ;;  %v1064_v20 = vld [vmem:[%s1250_s24 + $0x24] ss:$8 sps:$4 sm:$0xff]   ;;  %v1059_v26 = vld [vmem:[%s1250_s24] ss:$8 sps:$4 sm:$0xff]   ;;  %v1065_v28 = vld [vmem:[%s1250_s24 + $0x14] ss:$8 sps:$4 sm:$0xff]  }
  0x33   : > { %934 = vmatprep.subr.bf16.mxu0 %v1047_v12  ;;  %972 = vmatprep.subr.bf16.mxu1 %v1047_v12  ;;  %v1062_v27 = vld [vmem:[%s1250_s24 + $0x20] ss:$8 sps:$4 sm:$0xff]   ;;  %v1067_v29 = vld [vmem:[%s1250_s24 + $0x34] ss:$8 sps:$4 sm:$0xff]   ;;  %v1069_v30 = vld [vmem:[%s1250_s24 + $0x10] ss:$8 sps:$4 sm:$0xff]  }
  0x34   : > { %533 = vmatprep.mubr.bf16.mxu0 %v1061_v19  ;;  %549 = vmatprep.mubr.bf16.mxu1 %v1064_v20  ;;  %v1070_v31 = vld [vmem:[%s1250_s24 + $0x30] ss:$8 sps:$4 sm:$0xff]  }
  0x36   : > { %935 = vmatpush3.bf16.msra.mxu0 %v1048_v13  ;;  %980 = vmatpush3.bf16.msra.mxu1 %v1048_v13 }
  0x37   : > { %936 = vmatprep.subr.bf16.mxu0 %v1049_v14  ;;  %973 = vmatprep.subr.bf16.mxu1 %v1049_v14 }
  0x3a   : > { %937 = vmatpush3.bf16.msra.mxu0 %v1050_v15  ;;  %981 = vmatpush3.bf16.msra.mxu1 %v1050_v15 }
  0x3b   : > { %938 = vmatprep.subr.bf16.mxu0 %v1051_v16  ;;  %974 = vmatprep.subr.bf16.mxu1 %v1051_v16 }
  0x3e   : > { %939 = vmatpush3.bf16.msra.mxu0 %v1052_v17  ;;  %982 = vmatpush3.bf16.msra.mxu1 %v1052_v17 }
  0x3f   : > { %940 = vmatprep.subr.bf16.mxu0 %v1053_v18  ;;  %975 = vmatprep.subr.bf16.mxu1 %v1053_v18 }
  0x42   : > { %941 = vmatpush3.bf16.msra.mxu0 %v1054_v21  ;;  %983 = vmatpush3.bf16.msra.mxu1 %v1054_v21 }
  0x43   : > { %942 = vmatprep.subr.bf16.mxu0 %v1055_v22  ;;  %976 = vmatprep.subr.bf16.mxu1 %v1055_v22 }
  0x46   : > { %943 = vmatpush3.bf16.msra.mxu0 %v1056_v23  ;;  %984 = vmatpush3.bf16.msra.mxu1 %v1056_v23 }
  0x47   : > { %944 = vmatprep.subr.bf16.mxu0 %v1057_v24  ;;  %977 = vmatprep.subr.bf16.mxu1 %v1057_v24 }
  0x4a   : > { %945 = vmatpush3.bf16.msra.mxu0 %v1058_v25  ;;  %985 = vmatpush3.bf16.msra.mxu1 %v1058_v25 }
  0x4d   : > { %534 = vmatmul.mubr.bf16.vlgmr.msra.gmra.mrb[0].mxu0 %v1059_v26  ;;  %550 = vmatmul.mubr.bf16.vlgmr.msra.gmra.mrb[0].mxu1 %v1062_v27 }
  0x4e   : > { %541 = vmatprep.mubr.bf16.mxu0 %v1065_v28  ;;  %557 = vmatprep.mubr.bf16.mxu1 %v1067_v29 }
  0x55   : > { %542 = vmatmul.mubr.bf16.gmra.mrb[4].mxu0 %v1069_v30  ;;  %558 = vmatmul.mubr.bf16.gmra.mrb[4].mxu1 %v1070_v31 }
 0x120   : > { %v946_v32 = vpop.f32.mrb[0].mxu0  ;;  %v958_v33 = vpop.f32.mrb[0].mxu1 }
 0x121   : > { %v947_v34 = vpop.f32.mrb[1].mxu0  ;;  %v959_v35 = vpop.f32.mrb[1].mxu1 }
 0x122   : > { %v948_v36 = vadd.f32 %v947_v34, %v946_v32  ;;  %v960_v37 = vadd.f32 %v959_v35, %v958_v33  ;;  %v949_v38 = vpop.f32.mrb[2].mxu0  ;;  %v961_v39 = vpop.f32.mrb[2].mxu1 }
 0x123   : > { %v950_v40 = vpop.f32.mrb[3].mxu0  ;;  %v962_v41 = vpop.f32.mrb[3].mxu1 }
 0x124   : > { %v951_v42 = vadd.f32 %v950_v40, %v949_v38  ;;  %v963_v43 = vadd.f32 %v962_v41, %v961_v39  ;;  %570 = vst [vmem:[#allocation2] sm:$0xff] (!%p886_p13), %v948_v36  ;;  %574 = vst [vmem:[#allocation2 + $0x20] sm:$0xff] (!%p886_p13), %v960_v37 }
 0x126   : > { %569 = sbr.rel (%p886_p13) target bundleno = 303 (0x12f), region = 70  ;;  %571 = vst [vmem:[#allocation2 + $0x8] sm:$0xff] (!%p886_p13), %v951_v42  ;;  %575 = vst [vmem:[#allocation2 + $0x28] sm:$0xff] (!%p886_p13), %v963_v43 }
 0x128   : > { %v952_v44 = vpop.f32.mrb[4].mxu0  ;;  %v964_v45 = vpop.f32.mrb[4].mxu1 }
 0x129   : > { %v953_v46 = vpop.f32.mrb[5].mxu0  ;;  %v965_v47 = vpop.f32.mrb[5].mxu1 }
 0x12a   : > { %v954_v48 = vadd.f32 %v953_v46, %v952_v44  ;;  %v966_v49 = vadd.f32 %v965_v47, %v964_v45  ;;  %v955_v50 = vpop.f32.mrb[6].mxu0  ;;  %v967_v51 = vpop.f32.mrb[6].mxu1 }
 0x12b   : > { %v956_v52 = vpop.f32.mrb[7].mxu0  ;;  %v968_v53 = vpop.f32.mrb[7].mxu1 }
 0x12c   : > { %v957_v54 = vadd.f32 %v956_v52, %v955_v50  ;;  %v969_v55 = vadd.f32 %v968_v53, %v967_v51  ;;  %572 = vst [vmem:[#allocation2 + $0x10] sm:$0xff] (!%p886_p13), %v954_v48  ;;  %576 = vst [vmem:[#allocation2 + $0x30] sm:$0xff] (!%p886_p13), %v966_v49 }
 0x12e   : > { %573 = vst [vmem:[#allocation2 + $0x18] sm:$0xff] %v957_v54  ;;  %577 = vst [vmem:[#allocation2 + $0x38] sm:$0xff] %v969_v55 }
 0x12f PF: > { %p887_p0 = scmp.le.s32.totalorder %s1109_s17, 0 }
 0x130   : > { %v582_v56 = vld [vmem:[#allocation2] sm:$0xff] (!%p887_p0)  ;;  %v583_v57 = vld [vmem:[#allocation2 + $0x8] sm:$0xff] (!%p887_p0) }
 0x131   : > { %581 = sbr.rel (%p887_p0) target bundleno = 314 (0x13a), region = 74  ;;  %v590_v59 = vadd.f32 (!%p887_p0), %v948_v36, %v582_v56  ;;  %v591_v60 = vadd.f32 (!%p887_p0), %v951_v42, %v583_v57  ;;  %v586_v63 = vld [vmem:[#allocation2 + $0x20] sm:$0xff] (!%p887_p0)  ;;  %v587_v0 = vld [vmem:[#allocation2 + $0x28] sm:$0xff] (!%p887_p0) }
 0x132   : > { %v594_v2 = vadd.f32 (!%p887_p0), %v960_v37, %v586_v63  ;;  %v595_v3 = vadd.f32 (!%p887_p0), %v963_v43, %v587_v0 }
 0x133   : > { %598 = vst [vmem:[#allocation2] sm:$0xff] (!%p887_p0), %v590_v59  ;;  %599 = vst [vmem:[#allocation2 + $0x8] sm:$0xff] (!%p887_p0), %v591_v60 }
 0x134   : > { %602 = vst [vmem:[#allocation2 + $0x20] sm:$0xff] (!%p887_p0), %v594_v2  ;;  %603 = vst [vmem:[#allocation2 + $0x28] sm:$0xff] (!%p887_p0), %v595_v3 }
 0x135   : > { %v584_v58 = vld [vmem:[#allocation2 + $0x10] sm:$0xff] (!%p887_p0)  ;;  %v585_v62 = vld [vmem:[#allocation2 + $0x18] sm:$0xff] (!%p887_p0) }
 0x136   : > { %v592_v61 = vadd.f32 (!%p887_p0), %v954_v48, %v584_v58  ;;  %v593_v1 = vadd.f32 (!%p887_p0), %v957_v54, %v585_v62  ;;  %v588_v4 = vld [vmem:[#allocation2 + $0x30] sm:$0xff] (!%p887_p0)  ;;  %v589_v5 = vld [vmem:[#allocation2 + $0x38] sm:$0xff] (!%p887_p0) }
 0x137   : > { %v596_v6 = vadd.f32 (!%p887_p0), %v966_v49, %v588_v4  ;;  %v597_v7 = vadd.f32 (!%p887_p0), %v969_v55, %v589_v5 }
 0x138   : > { %600 = vst [vmem:[#allocation2 + $0x10] sm:$0xff] %v592_v61  ;;  %601 = vst [vmem:[#allocation2 + $0x18] sm:$0xff] %v593_v1 }
 0x139   : > { %604 = vst [vmem:[#allocation2 + $0x30] sm:$0xff] %v596_v6  ;;  %605 = vst [vmem:[#allocation2 + $0x38] sm:$0xff] %v597_v7 }
 0x13a PF: > { %p888_p1 = scmp.ne.s32.totalorder %s1109_s17, 4 }
 0x13c   : > { %609 = sbr.rel (%p888_p1) target bundleno = 349 (0x15d), region = 78  ;;  %v610_v8 = vld [vmem:[#allocation2] sm:$0xff] (!%p888_p1)  ;;  %v611_v9 = vld [vmem:[#allocation2 + $0x8] sm:$0xff] (!%p888_p1) }
 0x13d   : > { %v910_v11 = vpack.c.bf16 (!%p888_p1), %v611_v9, %v610_v8  ;;  %v658_v12 = vadd.f32 (!%p888_p1), %v611_v9, %v610_v8  ;;  %v671_v13 = vmul.f32 (!%p888_p1), %v610_v8, %v610_v8  ;;  %v672_v14 = vmul.f32 (!%p888_p1), %v611_v9, %v611_v9  ;;  %v614_v16 = vld [vmem:[#allocation2 + $0x20] sm:$0xff] (!%p888_p1)  ;;  %v615_v17 = vld [vmem:[#allocation2 + $0x28] sm:$0xff] (!%p888_p1) }
 0x13e   : > { %v920_v20 = vpack.c.bf16 (!%p888_p1), %v615_v17, %v614_v16  ;;  %v675_v29 = vmul.f32 (!%p888_p1), %v614_v16, %v614_v16  ;;  %v676_v32 = vmul.f32 (!%p888_p1), %v615_v17, %v615_v17 }
 0x13f   : > { %911 = vst [vmem:[%s1225_s6] sm:$0xff] (!%p888_p1), %v910_v11   ;;  %v679_v21 = vadd.f32 (!%p888_p1), %v672_v14, %v671_v13 }
 0x140   : > { %v616_v24 = vld [vmem:[#allocation2 + $0x30] sm:$0xff] (!%p888_p1)  ;;  %v617_v25 = vld [vmem:[#allocation2 + $0x38] sm:$0xff] (!%p888_p1)  ;;  %928 = vst [vmem:[%s1225_s6 + $0x10] sm:$0xff] (!%p888_p1), %v920_v20  }
 0x141   : > { %v612_v10 = vld [vmem:[#allocation2 + $0x10] sm:$0xff] (!%p888_p1)  ;;  %v613_v15 = vld [vmem:[#allocation2 + $0x18] sm:$0xff] (!%p888_p1)  ;;  %v925_v26 = vpack.c.bf16 (!%p888_p1), %v617_v25, %v616_v24  ;;  %v677_v35 = vmul.f32 (!%p888_p1), %v616_v24, %v616_v24  ;;  %v678_v38 = vmul.f32 (!%p888_p1), %v617_v25, %v617_v25 }
 0x142   : > { %v915_v18 = vpack.c.bf16 (!%p888_p1), %v613_v15, %v612_v10  ;;  %v673_v19 = vmul.f32 (!%p888_p1), %v612_v10, %v612_v10  ;;  %v659_v22 = vadd.f32 (!%p888_p1), %v658_v12, %v612_v10  ;;  %v674_v23 = vmul.f32 (!%p888_p1), %v613_v15, %v613_v15 }
 0x143   : > { %929 = vst [vmem:[%s1225_s6 + $0x18] sm:$0xff] %v925_v26  }
 0x144   : > { %927 = vst [vmem:[%s1225_s6 + $0x8] sm:$0xff] %v915_v18   ;;  %v660_v27 = vadd.f32 %v659_v22, %v613_v15  ;;  %v680_v28 = vadd.f32 %v679_v21, %v673_v19 }
 0x146   : > { %v681_v30 = vadd.f32 %v680_v28, %v674_v23  ;;  %v661_v31 = vadd.f32 %v660_v27, %v614_v16 }
 0x148   : > { %v662_v33 = vadd.f32 %v661_v31, %v615_v17  ;;  %v682_v34 = vadd.f32 %v681_v30, %v675_v29 }
 0x14a   : > { %v683_v36 = vadd.f32 %v682_v34, %v676_v32  ;;  %v663_v37 = vadd.f32 %v662_v33, %v616_v24 }
 0x14c   : > { %v664_v39 = vadd.f32 %v663_v37, %v617_v25  ;;  %v684_v40 = vadd.f32 %v683_v36, %v677_v35 }
 0x14e   : > { %v665_v41 = vrot.slane %v664_v39, 4  ;;  %v685_v42 = vadd.f32 %v684_v40, %v678_v38 }
 0x150   : > { %v666_v43 = vadd.f32 %v665_v41, %v664_v39  ;;  %v686_v44 = vrot.slane %v685_v42, 4 }
 0x152   : > { %v667_v45 = vrot.slane %v666_v43, 2  ;;  %v687_v46 = vadd.f32 %v686_v44, %v685_v42 }
 0x154   : > { %v668_v47 = vadd.f32 %v667_v45, %v666_v43  ;;  %v688_v48 = vrot.slane %v687_v46, 2 }
 0x156   : > { %v669_v49 = vrot.slane %v668_v47, 1  ;;  %v689_v50 = vadd.f32 %v688_v48, %v687_v46 }
 0x158   : > { %v670_v51 = vadd.f32 %v669_v49, %v668_v47  ;;  %v690_v52 = vrot.slane %v689_v50, 1 }
 0x15a   : > { %692 = vst [vmem:[%s1235_s10] sm:$0xff] %v670_v51  ;;  %v691_v53 = vadd.f32 %v690_v52, %v689_v50 }
 0x15c   : > { %693 = vst [vmem:[%s1240_s13] sm:$0xff] %v691_v53 }
 0x15d PF: > { %s15_s21 = sadd.s32 1, %s1125_s21   ;;  %s1300_s15 = smov %s1105_s16 }
 0x15e   : > { %p12_p2 = scmp.ge.s32.totalorder %s15_s21, 12   ;;  %s1301_s16 = smov %s1203_s28 }
 0x15f   : > { %s1302_s17 = smov %s1117_s19  ;;  %s1303_s18 = smov %s1121_s20 }
 0x160   : > { %s1304_s19 = smov %s1307_s22  ;;  %s1305_s20 = smov %s1311_s23 }
 0x161   :  { %14 = sbr.rel (!%p12_p2) target bundleno = 4 (0x4), region = 140 }

// kernel: basic_block1_forward.15
= control target key start
LH: loop header
LB: loop body
LE: loop exit
PB: predicated region body
PF: predicated region fallthrough
CT: control target
= control target key end

     0   :  { %s638_s21 = smov 0   ;;  %s697_s0 = inlined_call_operand.vmem [shape: bf16[128,128], index: 0, kind: input, shape index: {}]   ;;  %s698_s1 = inlined_call_operand.vmem [shape: bf16[128,128], index: 1, kind: input, shape index: {}]   ;;  %s699_s2 = inlined_call_operand.vmem [shape: f32[1,128], index: 2, kind: input, shape index: {}]   ;;  %s700_s3 = inlined_call_operand.vmem [shape: f32[1,128], index: 3, kind: input, shape index: {}]   ;;  %s701_s4 = inlined_call_operand.vmem [shape: f32[1,128], index: 4, kind: input, shape index: {}]   ;;  %s702_s5 = inlined_call_operand.vmem [shape: f32[1,128], index: 5, kind: input, shape index: {}]   ;;  %s703_s6 = inlined_call_operand.vmem [shape: bf16[128,128], index: 6, kind: output, shape index: {}]  }
   0x1 LB: > { %s493_s22 = sadd.s32 4294967295, %s601_s21   ;;  %p497_p0 = scmp.ge.s32.totalorder %s601_s21, 1  ;;  %s601_s21 = sphi %s638_s21, %s16_s21  }
   0x2   : > { %p224_p1 = scmp.lt.s32.totalorder %s601_s21, 3 }
   0x4   : > { %p225_p2 = pnand %p497_p0, %p224_p1 }
   0x5   : > { %s498_s23 = sshll.u32 (!%p225_p2), %s493_s22, 3  ;;  %v504_v2 = vld [vmem:[%s699_s2] ss:$0 sm:$0xff] (!%p225_p2) }
   0x6   : > { %228 = sbr.rel (%p225_p2) target bundleno = 42 (0x2a), region = 44  ;;  %p260_p3 = scmp.lt.s32.totalorder (!%p225_p2), %s498_s23, 15  ;;  %v669_v6 = vld [vmem:[%s701_s4] ss:$0 sm:$0xff] (!%p225_p2) }
   0x7   : > { %v505_v10 = vld [vmem:[%s700_s3] ss:$0 sm:$0xff] (!%p225_p2) }
   0x8   : > { %v507_v29 = vld [vmem:[%s702_s5] ss:$0 sm:$0xff] (!%p225_p2) }
   0xd   : > { %s705_s23 = smov (!%p260_p3, %s498_s23), 15 }
   0xe   : > { %s646_s24 = sshll.u32 %s705_s23, 2 }
   0xf   : > { %s652_s27 = scalar_lea.vmem %s697_s0, %s646_s24  ;;  %s658_s30 = scalar_lea.vmem %s698_s1, %s646_s24 }
  0x10   : > { %v527_v0 = vld [vmem:[%s652_s27] sm:$0xff]   ;;  %v578_v1 = vld [vmem:[%s652_s27 + $0x8] sm:$0xff]   ;;  %v579_v15 = vld [vmem:[%s652_s27 + $0x10] sm:$0xff]   ;;  %s275_s17 = scalar_lea.vmem %s703_s6, %s646_s24 }
  0x11   : > { %v528_v3 = vunpack.c.l.bf16 %v527_v0  ;;  %v529_v4 = vunpack.c.h.bf16 %v527_v0  ;;  %v543_v5 = vld [vmem:[%s658_s30] sm:$0xff]   ;;  %v532_v7 = vunpack.c.l.bf16 %v578_v1  ;;  %v533_v8 = vunpack.c.h.bf16 %v578_v1  ;;  %v581_v9 = vld [vmem:[%s658_s30 + $0x8] sm:$0xff]   ;;  %v582_v20 = vld [vmem:[%s658_s30 + $0x10] sm:$0xff]  }
  0x12   : > { %v544_v11 = vunpack.c.l.bf16 %v543_v5  ;;  %v545_v12 = vunpack.c.h.bf16 %v543_v5  ;;  %v548_v13 = vunpack.c.l.bf16 %v581_v9  ;;  %v549_v14 = vunpack.c.h.bf16 %v581_v9  ;;  %v580_v34 = vld [vmem:[%s652_s27 + $0x18] sm:$0xff]  }
  0x13   : > { %v300_v16 = vmul.f32 %v528_v3, %v504_v2  ;;  %v301_v17 = vmul.f32 %v529_v4, %v504_v2  ;;  %v302_v18 = vmul.f32 %v532_v7, %v504_v2  ;;  %v303_v19 = vmul.f32 %v533_v8, %v504_v2  ;;  %v583_v51 = vld [vmem:[%s658_s30 + $0x18] sm:$0xff]  }
  0x14   : > { %v346_v21 = vmul.f32 %v544_v11, %v669_v6  ;;  %v347_v22 = vmul.f32 %v545_v12, %v669_v6  ;;  %v348_v23 = vmul.f32 %v548_v13, %v669_v6  ;;  %v349_v24 = vmul.f32 %v549_v14, %v669_v6 }
  0x15   : > { %v315_v25 = vadd.f32 %v505_v10, %v300_v16  ;;  %v316_v26 = vadd.f32 %v505_v10, %v301_v17  ;;  %v317_v27 = vadd.f32 %v505_v10, %v302_v18  ;;  %v318_v28 = vadd.f32 %v505_v10, %v303_v19 }
  0x16   : > { %v536_v30 = vunpack.c.l.bf16 %v579_v15  ;;  %v537_v31 = vunpack.c.h.bf16 %v579_v15  ;;  %v552_v32 = vunpack.c.l.bf16 %v582_v20  ;;  %v553_v33 = vunpack.c.h.bf16 %v582_v20 }
  0x17   : > { %v354_v35 = vadd.f32 %v346_v21, %v315_v25  ;;  %v355_v36 = vadd.f32 %v347_v22, %v316_v26  ;;  %v356_v37 = vadd.f32 %v348_v23, %v317_v27  ;;  %v357_v38 = vadd.f32 %v349_v24, %v318_v28 }
  0x18   : > { %v304_v39 = vmul.f32 %v536_v30, %v504_v2  ;;  %v305_v40 = vmul.f32 %v537_v31, %v504_v2  ;;  %v350_v41 = vmul.f32 %v552_v32, %v669_v6  ;;  %v351_v42 = vmul.f32 %v553_v33, %v669_v6 }
  0x19   : > { %v369_v43 = vadd.f32 %v507_v29, %v354_v35  ;;  %v370_v44 = vadd.f32 %v507_v29, %v355_v36  ;;  %v371_v45 = vadd.f32 %v507_v29, %v356_v37  ;;  %v372_v46 = vadd.f32 %v507_v29, %v357_v38 }
  0x1a   : > { %v319_v47 = vadd.f32 %v505_v10, %v304_v39  ;;  %v320_v48 = vadd.f32 %v505_v10, %v305_v40  ;;  %v540_v49 = vunpack.c.l.bf16 %v580_v34  ;;  %v541_v50 = vunpack.c.h.bf16 %v580_v34 }
  0x1b   : > { %v377_v52 = vmax.f32 %v369_v43, 0.0  ;;  %v378_v53 = vmax.f32 %v370_v44, 0.0  ;;  %v379_v54 = vmax.f32 %v371_v45, 0.0  ;;  %v380_v55 = vmax.f32 %v372_v46, 0.0 }
  0x1c   : > { %v358_v56 = vadd.f32 %v350_v41, %v319_v47  ;;  %v359_v57 = vadd.f32 %v351_v42, %v320_v48  ;;  %v306_v58 = vmul.f32 %v540_v49, %v504_v2  ;;  %v307_v59 = vmul.f32 %v541_v50, %v504_v2 }
  0x1d   : > { %v561_v60 = vpack.c.bf16 %v378_v53, %v377_v52  ;;  %v566_v61 = vpack.c.bf16 %v380_v55, %v379_v54  ;;  %v556_v62 = vunpack.c.l.bf16 %v583_v51  ;;  %v557_v63 = vunpack.c.h.bf16 %v583_v51 }
  0x1e   : > { %v373_v0 = vadd.f32 %v507_v29, %v358_v56  ;;  %v374_v1 = vadd.f32 %v507_v29, %v359_v57  ;;  %v321_v3 = vadd.f32 %v505_v10, %v306_v58  ;;  %v322_v4 = vadd.f32 %v505_v10, %v307_v59 }
  0x1f   : > { %562 = vst [vmem:[%s275_s17] sm:$0xff] %v561_v60   ;;  %584 = vst [vmem:[%s275_s17 + $0x8] sm:$0xff] %v566_v61   ;;  %v352_v5 = vmul.f32 %v556_v62, %v669_v6  ;;  %v353_v7 = vmul.f32 %v557_v63, %v669_v6 }
  0x20   : > { %v381_v8 = vmax.f32 %v373_v0, 0.0  ;;  %v382_v9 = vmax.f32 %v374_v1, 0.0 }
  0x21   : > { %v360_v11 = vadd.f32 %v352_v5, %v321_v3  ;;  %v361_v12 = vadd.f32 %v353_v7, %v322_v4 }
  0x22   : > { %v571_v13 = vpack.c.bf16 %v382_v9, %v381_v8 }
  0x23   : > { %v375_v2 = vadd.f32 %v507_v29, %v360_v11  ;;  %v376_v14 = vadd.f32 %v507_v29, %v361_v12 }
  0x24   : > { %585 = vst [vmem:[%s275_s17 + $0x10] sm:$0xff] %v571_v13  }
  0x25   : > { %v383_v15 = vmax.f32 %v375_v2, 0.0  ;;  %v384_v16 = vmax.f32 %v376_v14, 0.0 }
  0x27   : > { %v576_v17 = vpack.c.bf16 %v384_v16, %v383_v15 }
  0x29   : > { %586 = vst [vmem:[%s275_s17 + $0x18] sm:$0xff] %v576_v17  }
  0x2a PF: > { %s16_s21 = sadd.s32 1, %s601_s21  }
  0x2b   : > { %p13_p4 = scmp.ge.s32.totalorder %s16_s21, 4  }
  0x2d   :  { %15 = sbr.rel (!%p13_p4) target bundleno = 1 (0x1), region = 77 }

</bundles_post_ra>
